<compile_context>
chip_gen: v6e
topology: v6e:2x2x1
jax: 0.10.0
libtpu: 0.0.40
codegen_flags: <defaults>
</compile_context>

<pallas_src>
import functools

import jax
import jax.numpy as jnp
from jax import lax
from jax.experimental import pallas as pl
from jax.experimental.pallas import tpu as pltpu


def bsec_rnn_kernel(x_ref,                       # (T, B_blk)   time x batch-lanes
                    wihT_ref, whhT_ref, brnnT_ref,   # (H,1) (H,H) (H,1)
                    w1xT_ref, w1hT_ref, b1T_ref,     # (32,1) (32,H) (32,1)
                    w2T_ref, b2T_ref,                # (16,32) (16,1)
                    w3T_ref, b3T_ref,                # (8,16)  (8,1)
                    w4T_ref, b4T_ref,                # (out,8) (out,1)
                    out_ref,                         # (out, T*B_blk)  lane-dense
                    *, seq_len):
    H = whhT_ref.shape[0]
    B = x_ref.shape[1]

    # Recurrence weights loaded once, resident across the whole time loop.
    wihT = wihT_ref[...]      # (H, 1)
    whhT = whhT_ref[...]      # (H, H)
    brnnT = brnnT_ref[...]    # (H, 1)

    # ---- serial recurrence (transposed): h^T_t = tanh(Wih^T x^T_t + Whh^T h^T_{t-1} + b^T)
    # Fully unrolled for small static T; h_t stay live (no VMEM scratch).
    h = jnp.zeros((H, B), jnp.float32)
    hs, xs = [], []
    for t in range(seq_len):
        x_t = x_ref[pl.ds(t, 1), :]                      # (1, B) full lane row
        xs.append(x_t)
        # x-term is independent of h -> off the serial chain; only
        # slice + dot + add + tanh sit on the critical path.
        h = jnp.tanh(wihT * x_t + brnnT
                     + jnp.dot(whhT, h, preferred_element_type=jnp.float32))
        hs.append(h)

    # Lane-tile-aligned packs (B_blk is a multiple of 128 lanes).
    henT = jnp.concatenate(hs, axis=1)                   # (H, T*B)
    xT = jnp.concatenate(xs, axis=1)                     # (1, T*B)

    # ---- hoisted MLP head: a few transposed GEMMs over all T*B columns.
    # Weights arrive already in their compute dtype (pre-cast in the wrapper),
    # so the only in-kernel cast is the activation when running the bf16 path.
    def mm(wT_ref, a):
        w = wT_ref[...]
        return jnp.dot(w, a.astype(w.dtype), preferred_element_type=jnp.float32)

    # fc1 on cat([x, hen]) == w1x^T * x^T + w1h^T @ hen^T
    z1 = jnp.maximum(mm(w1hT_ref, henT) + w1xT_ref[...] * xT + b1T_ref[...], 0.0)
    z2 = jnp.maximum(mm(w2T_ref, z1) + b2T_ref[...], 0.0)
    z3 = jnp.maximum(mm(w3T_ref, z2) + b3T_ref[...], 0.0)
    # single lane-dense store of the whole (out, T*B) result
    out_ref[...] = (mm(w4T_ref, z3) + b4T_ref[...]).astype(out_ref.dtype)


def bsec_rnn_forward(x, params, *, block_b=128, mlp_dtype=jnp.float32):
    """x: (B, T, 1) batch-first, like the PyTorch module.

    block_b: batch lanes per grid step (multiple of 128). Batch is zero-padded
    to a multiple of block_b; padded samples are sliced off at the end.
    mlp_dtype=jnp.bfloat16 enables the MXU fast path for the feed-forward
    GEMMs (recurrence stays float32).
    """
    B, T, I = x.shape
    assert I == 1, "input_size == 1 (as in the PyTorch module)"
    assert block_b % 128 == 0, "block_b must be a multiple of 128 lanes"
    H = params["whh"].shape[0]
    out_size = params["w4"].shape[1]

    # ---- lane-dense input layout: batch on lanes, padded to block_b.
    B_pad = ((B + block_b - 1) // block_b) * block_b
    nB = B_pad // block_b
    x_bt = jnp.zeros((B_pad, T), jnp.float32).at[:B].set(
        x[..., 0].astype(jnp.float32))
    x_blocks = x_bt.reshape(nB, block_b, T).transpose(0, 2, 1)   # (nB, T, B_blk)

    f32 = jnp.float32
    mlpw = lambda w: w.T.astype(mlp_dtype)        # pre-cast MLP weights (review)
    args = (
        x_blocks,
        params["wih"].T.astype(f32),              # (H, 1)
        params["whh"].T.astype(f32),              # (H, H)
        params["brnn"].T.astype(f32),             # (H, 1)
        params["w1x"].T.astype(f32),              # (32, 1)  VPU term, keep f32
        mlpw(params["w1h"]),                      # (32, H)
        params["b1"].T.astype(f32),               # (32, 1)
        mlpw(params["w2"]), params["b2"].T.astype(f32),
        mlpw(params["w3"]), params["b3"].T.astype(f32),
        mlpw(params["w4"]), params["b4"].T.astype(f32),
    )

    def full_spec(a):
        # whole (tiny) weight array resident every grid step
        return pl.BlockSpec(a.shape, lambda i, _nd=a.ndim: (0,) * _nd)

    in_specs = ([pl.BlockSpec((None, T, block_b), lambda i: (i, 0, 0))]
                + [full_spec(a) for a in args[1:]])
    out_specs = pl.BlockSpec((None, out_size, T * block_b), lambda i: (i, 0, 0))

    kernel = functools.partial(bsec_rnn_kernel, seq_len=T)
    y_blocks = pl.pallas_call(
        kernel,
        grid=(nB,),                               # batch-block grid (parallel)
        out_shape=jax.ShapeDtypeStruct((nB, out_size, T * block_b), jnp.float32),
        in_specs=in_specs,
        out_specs=out_specs,
        compiler_params=pltpu.CompilerParams(
            dimension_semantics=("parallel",),
            vmem_limit_bytes=32 * 1024 * 1024),   # explicit budget (v7x: 64 MiB phys)
    )(*args)

    # (nB, out, T*B_blk) -> (B_pad, T, out) -> drop batch padding
    y = y_blocks.reshape(nB, out_size, T, block_b).transpose(0, 3, 2, 1)
    return y.reshape(B_pad, T, out_size)[:B]


def init_params(key, hidden_size, input_size=1, output_size=1):
    """Deterministic PyTorch-style uniform(-1/sqrt(fan_in), 1/sqrt(fan_in)) init."""
    def uni(k, shape, fan_in):
        bound = 1.0 / jnp.sqrt(jnp.float32(fan_in))
        return jax.random.uniform(k, shape, jnp.float32, -bound, bound)

    ks = jax.random.split(key, 14)
    H = hidden_size
    # RNN params stored "natural" (in, out); the wrapper transposes for the kernel.
    wih = uni(ks[0], (input_size, H), H)
    whh = uni(ks[1], (H, H), H)
    b_ih = uni(ks[2], (1, H), H)
    b_hh = uni(ks[3], (1, H), H)
    # fc1: (H + input_size) -> 32, split into x-feature rows and hidden rows
    # (for real PyTorch weights: w1x = fc1.weight[:, :input_size].T,
    #  w1h = fc1.weight[:, input_size:].T, matching cat([x, hen], dim=2)).
    fan1 = H + input_size
    w1x = uni(ks[4], (input_size, 32), fan1)
    w1h = uni(ks[5], (H, 32), fan1)
    b1 = uni(ks[6], (1, 32), fan1)
    w2 = uni(ks[7], (32, 16), 32)
    b2 = uni(ks[8], (1, 16), 32)
    w3 = uni(ks[9], (16, 8), 16)
    b3 = uni(ks[10], (1, 8), 16)
    w4 = uni(ks[11], (8, output_size), 8)
    b4 = uni(ks[12], (1, output_size), 8)
    return dict(wih=wih, whh=whh, brnn=b_ih + b_hh,
                w1x=w1x, w1h=w1h, b1=b1,
                w2=w2, b2=b2, w3=w3, b3=b3, w4=w4, b4=b4)


def reference_forward(x, p):
    """Pure-JAX reference mirroring the PyTorch forward."""
    B, T, _ = x.shape
    H = p["whh"].shape[0]

    def cell(h, xt):
        h_new = jnp.tanh(xt @ p["wih"] + h @ p["whh"] + p["brnn"])
        return h_new, h_new

    _, hen = lax.scan(cell, jnp.zeros((B, H), jnp.float32),
                      jnp.transpose(x, (1, 0, 2)))            # (T, B, H)
    hen = jnp.transpose(hen, (1, 0, 2))                        # (B, T, H)
    z1 = jax.nn.relu(x @ p["w1x"] + hen @ p["w1h"] + p["b1"])
    z2 = jax.nn.relu(z1 @ p["w2"] + p["b2"])
    z3 = jax.nn.relu(z2 @ p["w3"] + p["b3"])
    return z3 @ p["w4"] + p["b4"]


if __name__ == "__main__":
    B, T, H = 8, 8, 32
    key = jax.random.PRNGKey(0)
    k_x, k_p = jax.random.split(key)
    x = jax.random.normal(k_x, (B, T, 1), jnp.float32)
    params = init_params(k_p, hidden_size=H, input_size=1, output_size=1)

    y = bsec_rnn_forward(x, params)
    y = jax.block_until_ready(y)

    y_ref = reference_forward(x, params)
    assert y.shape == (B, T, 1)
    assert jnp.allclose(y, y_ref, atol=2e-4, rtol=2e-4), "mismatch vs reference"
    print("KERNEL_OK")
</pallas_src>

<mosaic_0001>
module attributes {stable_mosaic.version = 11 : i64} {
  func.func @bsec_rnn_kernel(%arg0: i32, %arg1: memref<1x8x128xf32, #tpu.memory_space<vmem>>, %arg2: memref<32x1xf32, #tpu.memory_space<vmem>>, %arg3: memref<32x32xf32, #tpu.memory_space<vmem>>, %arg4: memref<32x1xf32, #tpu.memory_space<vmem>>, %arg5: memref<32x1xf32, #tpu.memory_space<vmem>>, %arg6: memref<32x32xf32, #tpu.memory_space<vmem>>, %arg7: memref<32x1xf32, #tpu.memory_space<vmem>>, %arg8: memref<16x32xf32, #tpu.memory_space<vmem>>, %arg9: memref<16x1xf32, #tpu.memory_space<vmem>>, %arg10: memref<8x16xf32, #tpu.memory_space<vmem>>, %arg11: memref<8x1xf32, #tpu.memory_space<vmem>>, %arg12: memref<1x8xf32, #tpu.memory_space<vmem>>, %arg13: memref<1x1xf32, #tpu.memory_space<vmem>>, %arg14: memref<1x1x1024xf32, #tpu.memory_space<vmem>>) attributes {dimension_semantics = [#tpu.dimension_semantics<parallel>], iteration_bounds = array<i64: 1>, scalar_prefetch = 0 : i64, scratch_operands = 0 : i64, tpu.core_type = #tpu.core_type<tc>, window_params = [{transform_indices = @transform_0, window_bounds = array<i64: 1, 8, 128>}, {pipeline_mode = #tpu.pipeline_mode<synchronous>, transform_indices = @transform_1, window_bounds = array<i64: 32, 1>}, {pipeline_mode = #tpu.pipeline_mode<synchronous>, transform_indices = @transform_2, window_bounds = array<i64: 32, 32>}, {pipeline_mode = #tpu.pipeline_mode<synchronous>, transform_indices = @transform_3, window_bounds = array<i64: 32, 1>}, {pipeline_mode = #tpu.pipeline_mode<synchronous>, transform_indices = @transform_4, window_bounds = array<i64: 32, 1>}, {pipeline_mode = #tpu.pipeline_mode<synchronous>, transform_indices = @transform_5, window_bounds = array<i64: 32, 32>}, {pipeline_mode = #tpu.pipeline_mode<synchronous>, transform_indices = @transform_6, window_bounds = array<i64: 32, 1>}, {pipeline_mode = #tpu.pipeline_mode<synchronous>, transform_indices = @transform_7, window_bounds = array<i64: 16, 32>}, {pipeline_mode = #tpu.pipeline_mode<synchronous>, transform_indices = @transform_8, window_bounds = array<i64: 16, 1>}, {pipeline_mode = #tpu.pipeline_mode<synchronous>, transform_indices = @transform_9, window_bounds = array<i64: 8, 16>}, {pipeline_mode = #tpu.pipeline_mode<synchronous>, transform_indices = @transform_10, window_bounds = array<i64: 8, 1>}, {pipeline_mode = #tpu.pipeline_mode<synchronous>, transform_indices = @transform_11, window_bounds = array<i64: 1, 8>}, {pipeline_mode = #tpu.pipeline_mode<synchronous>, transform_indices = @transform_12, window_bounds = array<i64: 1, 1>}, {transform_indices = @transform_13, window_bounds = array<i64: 1, 1, 1024>}]} {
    %c0 = arith.constant 0 : index
    %c0_0 = arith.constant 0 : index
    %0 = vector.load %arg2[%c0, %c0_0] : memref<32x1xf32, #tpu.memory_space<vmem>>, vector<32x1xf32>
    %c0_1 = arith.constant 0 : index
    %c0_2 = arith.constant 0 : index
    %1 = vector.load %arg3[%c0_1, %c0_2] : memref<32x32xf32, #tpu.memory_space<vmem>>, vector<32x32xf32>
    %c0_3 = arith.constant 0 : index
    %c0_4 = arith.constant 0 : index
    %2 = vector.load %arg4[%c0_3, %c0_4] : memref<32x1xf32, #tpu.memory_space<vmem>>, vector<32x1xf32>
    %cst = arith.constant 0.000000e+00 : f32
    %3 = vector.broadcast %cst : f32 to vector<32x128xf32>
    %c0_5 = arith.constant 0 : index
    %c0_6 = arith.constant 0 : index
    %c0_7 = arith.constant 0 : index
    %4 = vector.load %arg1[%c0_5, %c0_6, %c0_7] : memref<1x8x128xf32, #tpu.memory_space<vmem>>, vector<1x1x128xf32>
    %5 = vector.shape_cast %4 : vector<1x1x128xf32> to vector<1x128xf32>
    %6 = vector.broadcast %0 : vector<32x1xf32> to vector<32x128xf32>
    %7 = vector.broadcast %5 : vector<1x128xf32> to vector<32x128xf32>
    %8 = arith.mulf %6, %7 : vector<32x128xf32>
    %9 = vector.broadcast %2 : vector<32x1xf32> to vector<32x128xf32>
    %10 = arith.addf %8, %9 : vector<32x128xf32>
    %cst_8 = arith.constant dense<0.000000e+00> : vector<32x128xf32>
    %11 = tpu.matmul %1, %3, %cst_8 {dimension_numbers = #tpu.dot_dimension_numbers<[1], [0], [0], [1], [0, 0, 1, 1], [], []>} : vector<32x32xf32>, vector<32x128xf32>, vector<32x128xf32> -> vector<32x128xf32>
    %12 = arith.addf %10, %11 : vector<32x128xf32>
    %13 = math.tanh %12 : vector<32x128xf32>
    %c0_9 = arith.constant 0 : index
    %c1 = arith.constant 1 : index
    %c0_10 = arith.constant 0 : index
    %14 = vector.load %arg1[%c0_9, %c1, %c0_10] : memref<1x8x128xf32, #tpu.memory_space<vmem>>, vector<1x1x128xf32>
    %15 = vector.shape_cast %14 : vector<1x1x128xf32> to vector<1x128xf32>
    %16 = vector.broadcast %0 : vector<32x1xf32> to vector<32x128xf32>
    %17 = vector.broadcast %15 : vector<1x128xf32> to vector<32x128xf32>
    %18 = arith.mulf %16, %17 : vector<32x128xf32>
    %19 = vector.broadcast %2 : vector<32x1xf32> to vector<32x128xf32>
    %20 = arith.addf %18, %19 : vector<32x128xf32>
    %cst_11 = arith.constant dense<0.000000e+00> : vector<32x128xf32>
    %21 = tpu.matmul %1, %13, %cst_11 {dimension_numbers = #tpu.dot_dimension_numbers<[1], [0], [0], [1], [0, 0, 1, 1], [], []>} : vector<32x32xf32>, vector<32x128xf32>, vector<32x128xf32> -> vector<32x128xf32>
    %22 = arith.addf %20, %21 : vector<32x128xf32>
    %23 = math.tanh %22 : vector<32x128xf32>
    %c0_12 = arith.constant 0 : index
    %c2 = arith.constant 2 : index
    %c0_13 = arith.constant 0 : index
    %24 = vector.load %arg1[%c0_12, %c2, %c0_13] : memref<1x8x128xf32, #tpu.memory_space<vmem>>, vector<1x1x128xf32>
    %25 = vector.shape_cast %24 : vector<1x1x128xf32> to vector<1x128xf32>
    %26 = vector.broadcast %0 : vector<32x1xf32> to vector<32x128xf32>
    %27 = vector.broadcast %25 : vector<1x128xf32> to vector<32x128xf32>
    %28 = arith.mulf %26, %27 : vector<32x128xf32>
    %29 = vector.broadcast %2 : vector<32x1xf32> to vector<32x128xf32>
    %30 = arith.addf %28, %29 : vector<32x128xf32>
    %cst_14 = arith.constant dense<0.000000e+00> : vector<32x128xf32>
    %31 = tpu.matmul %1, %23, %cst_14 {dimension_numbers = #tpu.dot_dimension_numbers<[1], [0], [0], [1], [0, 0, 1, 1], [], []>} : vector<32x32xf32>, vector<32x128xf32>, vector<32x128xf32> -> vector<32x128xf32>
    %32 = arith.addf %30, %31 : vector<32x128xf32>
    %33 = math.tanh %32 : vector<32x128xf32>
    %c0_15 = arith.constant 0 : index
    %c3 = arith.constant 3 : index
    %c0_16 = arith.constant 0 : index
    %34 = vector.load %arg1[%c0_15, %c3, %c0_16] : memref<1x8x128xf32, #tpu.memory_space<vmem>>, vector<1x1x128xf32>
    %35 = vector.shape_cast %34 : vector<1x1x128xf32> to vector<1x128xf32>
    %36 = vector.broadcast %0 : vector<32x1xf32> to vector<32x128xf32>
    %37 = vector.broadcast %35 : vector<1x128xf32> to vector<32x128xf32>
    %38 = arith.mulf %36, %37 : vector<32x128xf32>
    %39 = vector.broadcast %2 : vector<32x1xf32> to vector<32x128xf32>
    %40 = arith.addf %38, %39 : vector<32x128xf32>
    %cst_17 = arith.constant dense<0.000000e+00> : vector<32x128xf32>
    %41 = tpu.matmul %1, %33, %cst_17 {dimension_numbers = #tpu.dot_dimension_numbers<[1], [0], [0], [1], [0, 0, 1, 1], [], []>} : vector<32x32xf32>, vector<32x128xf32>, vector<32x128xf32> -> vector<32x128xf32>
    %42 = arith.addf %40, %41 : vector<32x128xf32>
    %43 = math.tanh %42 : vector<32x128xf32>
    %c0_18 = arith.constant 0 : index
    %c4 = arith.constant 4 : index
    %c0_19 = arith.constant 0 : index
    %44 = vector.load %arg1[%c0_18, %c4, %c0_19] : memref<1x8x128xf32, #tpu.memory_space<vmem>>, vector<1x1x128xf32>
    %45 = vector.shape_cast %44 : vector<1x1x128xf32> to vector<1x128xf32>
    %46 = vector.broadcast %0 : vector<32x1xf32> to vector<32x128xf32>
    %47 = vector.broadcast %45 : vector<1x128xf32> to vector<32x128xf32>
    %48 = arith.mulf %46, %47 : vector<32x128xf32>
    %49 = vector.broadcast %2 : vector<32x1xf32> to vector<32x128xf32>
    %50 = arith.addf %48, %49 : vector<32x128xf32>
    %cst_20 = arith.constant dense<0.000000e+00> : vector<32x128xf32>
    %51 = tpu.matmul %1, %43, %cst_20 {dimension_numbers = #tpu.dot_dimension_numbers<[1], [0], [0], [1], [0, 0, 1, 1], [], []>} : vector<32x32xf32>, vector<32x128xf32>, vector<32x128xf32> -> vector<32x128xf32>
    %52 = arith.addf %50, %51 : vector<32x128xf32>
    %53 = math.tanh %52 : vector<32x128xf32>
    %c0_21 = arith.constant 0 : index
    %c5 = arith.constant 5 : index
    %c0_22 = arith.constant 0 : index
    %54 = vector.load %arg1[%c0_21, %c5, %c0_22] : memref<1x8x128xf32, #tpu.memory_space<vmem>>, vector<1x1x128xf32>
    %55 = vector.shape_cast %54 : vector<1x1x128xf32> to vector<1x128xf32>
    %56 = vector.broadcast %0 : vector<32x1xf32> to vector<32x128xf32>
    %57 = vector.broadcast %55 : vector<1x128xf32> to vector<32x128xf32>
    %58 = arith.mulf %56, %57 : vector<32x128xf32>
    %59 = vector.broadcast %2 : vector<32x1xf32> to vector<32x128xf32>
    %60 = arith.addf %58, %59 : vector<32x128xf32>
    %cst_23 = arith.constant dense<0.000000e+00> : vector<32x128xf32>
    %61 = tpu.matmul %1, %53, %cst_23 {dimension_numbers = #tpu.dot_dimension_numbers<[1], [0], [0], [1], [0, 0, 1, 1], [], []>} : vector<32x32xf32>, vector<32x128xf32>, vector<32x128xf32> -> vector<32x128xf32>
    %62 = arith.addf %60, %61 : vector<32x128xf32>
    %63 = math.tanh %62 : vector<32x128xf32>
    %c0_24 = arith.constant 0 : index
    %c6 = arith.constant 6 : index
    %c0_25 = arith.constant 0 : index
    %64 = vector.load %arg1[%c0_24, %c6, %c0_25] : memref<1x8x128xf32, #tpu.memory_space<vmem>>, vector<1x1x128xf32>
    %65 = vector.shape_cast %64 : vector<1x1x128xf32> to vector<1x128xf32>
    %66 = vector.broadcast %0 : vector<32x1xf32> to vector<32x128xf32>
    %67 = vector.broadcast %65 : vector<1x128xf32> to vector<32x128xf32>
    %68 = arith.mulf %66, %67 : vector<32x128xf32>
    %69 = vector.broadcast %2 : vector<32x1xf32> to vector<32x128xf32>
    %70 = arith.addf %68, %69 : vector<32x128xf32>
    %cst_26 = arith.constant dense<0.000000e+00> : vector<32x128xf32>
    %71 = tpu.matmul %1, %63, %cst_26 {dimension_numbers = #tpu.dot_dimension_numbers<[1], [0], [0], [1], [0, 0, 1, 1], [], []>} : vector<32x32xf32>, vector<32x128xf32>, vector<32x128xf32> -> vector<32x128xf32>
    %72 = arith.addf %70, %71 : vector<32x128xf32>
    %73 = math.tanh %72 : vector<32x128xf32>
    %c0_27 = arith.constant 0 : index
    %c7 = arith.constant 7 : index
    %c0_28 = arith.constant 0 : index
    %74 = vector.load %arg1[%c0_27, %c7, %c0_28] : memref<1x8x128xf32, #tpu.memory_space<vmem>>, vector<1x1x128xf32>
    %75 = vector.shape_cast %74 : vector<1x1x128xf32> to vector<1x128xf32>
    %76 = vector.broadcast %0 : vector<32x1xf32> to vector<32x128xf32>
    %77 = vector.broadcast %75 : vector<1x128xf32> to vector<32x128xf32>
    %78 = arith.mulf %76, %77 : vector<32x128xf32>
    %79 = vector.broadcast %2 : vector<32x1xf32> to vector<32x128xf32>
    %80 = arith.addf %78, %79 : vector<32x128xf32>
    %cst_29 = arith.constant dense<0.000000e+00> : vector<32x128xf32>
    %81 = tpu.matmul %1, %73, %cst_29 {dimension_numbers = #tpu.dot_dimension_numbers<[1], [0], [0], [1], [0, 0, 1, 1], [], []>} : vector<32x32xf32>, vector<32x128xf32>, vector<32x128xf32> -> vector<32x128xf32>
    %82 = arith.addf %80, %81 : vector<32x128xf32>
    %83 = math.tanh %82 : vector<32x128xf32>
    %84 = tpu.concatenate %13, %23, %33, %43, %53, %63, %73, %83 in 1 : vector<32x128xf32>, vector<32x128xf32>, vector<32x128xf32>, vector<32x128xf32>, vector<32x128xf32>, vector<32x128xf32>, vector<32x128xf32>, vector<32x128xf32> -> vector<32x1024xf32>
    %85 = tpu.concatenate %5, %15, %25, %35, %45, %55, %65, %75 in 1 : vector<1x128xf32>, vector<1x128xf32>, vector<1x128xf32>, vector<1x128xf32>, vector<1x128xf32>, vector<1x128xf32>, vector<1x128xf32>, vector<1x128xf32> -> vector<1x1024xf32>
    %c0_30 = arith.constant 0 : index
    %c0_31 = arith.constant 0 : index
    %86 = vector.load %arg6[%c0_30, %c0_31] : memref<32x32xf32, #tpu.memory_space<vmem>>, vector<32x32xf32>
    %cst_32 = arith.constant dense<0.000000e+00> : vector<32x1024xf32>
    %87 = tpu.matmul %86, %84, %cst_32 {dimension_numbers = #tpu.dot_dimension_numbers<[1], [0], [0], [1], [0, 0, 1, 1], [], []>} : vector<32x32xf32>, vector<32x1024xf32>, vector<32x1024xf32> -> vector<32x1024xf32>
    %c0_33 = arith.constant 0 : index
    %c0_34 = arith.constant 0 : index
    %88 = vector.load %arg5[%c0_33, %c0_34] : memref<32x1xf32, #tpu.memory_space<vmem>>, vector<32x1xf32>
    %89 = vector.broadcast %88 : vector<32x1xf32> to vector<32x1024xf32>
    %90 = vector.broadcast %85 : vector<1x1024xf32> to vector<32x1024xf32>
    %91 = arith.mulf %89, %90 : vector<32x1024xf32>
    %92 = arith.addf %87, %91 : vector<32x1024xf32>
    %c0_35 = arith.constant 0 : index
    %c0_36 = arith.constant 0 : index
    %93 = vector.load %arg7[%c0_35, %c0_36] : memref<32x1xf32, #tpu.memory_space<vmem>>, vector<32x1xf32>
    %94 = vector.broadcast %93 : vector<32x1xf32> to vector<32x1024xf32>
    %95 = arith.addf %92, %94 : vector<32x1024xf32>
    %cst_37 = arith.constant 0.000000e+00 : f32
    %96 = vector.broadcast %cst_37 : f32 to vector<32x1024xf32>
    %97 = arith.maximumf %95, %96 : vector<32x1024xf32>
    %c0_38 = arith.constant 0 : index
    %c0_39 = arith.constant 0 : index
    %98 = vector.load %arg8[%c0_38, %c0_39] : memref<16x32xf32, #tpu.memory_space<vmem>>, vector<16x32xf32>
    %cst_40 = arith.constant dense<0.000000e+00> : vector<16x1024xf32>
    %99 = tpu.matmul %98, %97, %cst_40 {dimension_numbers = #tpu.dot_dimension_numbers<[1], [0], [0], [1], [0, 0, 1, 1], [], []>} : vector<16x32xf32>, vector<32x1024xf32>, vector<16x1024xf32> -> vector<16x1024xf32>
    %c0_41 = arith.constant 0 : index
    %c0_42 = arith.constant 0 : index
    %100 = vector.load %arg9[%c0_41, %c0_42] : memref<16x1xf32, #tpu.memory_space<vmem>>, vector<16x1xf32>
    %101 = vector.broadcast %100 : vector<16x1xf32> to vector<16x1024xf32>
    %102 = arith.addf %99, %101 : vector<16x1024xf32>
    %cst_43 = arith.constant 0.000000e+00 : f32
    %103 = vector.broadcast %cst_43 : f32 to vector<16x1024xf32>
    %104 = arith.maximumf %102, %103 : vector<16x1024xf32>
    %c0_44 = arith.constant 0 : index
    %c0_45 = arith.constant 0 : index
    %105 = vector.load %arg10[%c0_44, %c0_45] : memref<8x16xf32, #tpu.memory_space<vmem>>, vector<8x16xf32>
    %cst_46 = arith.constant dense<0.000000e+00> : vector<8x1024xf32>
    %106 = tpu.matmul %105, %104, %cst_46 {dimension_numbers = #tpu.dot_dimension_numbers<[1], [0], [0], [1], [0, 0, 1, 1], [], []>} : vector<8x16xf32>, vector<16x1024xf32>, vector<8x1024xf32> -> vector<8x1024xf32>
    %c0_47 = arith.constant 0 : index
    %c0_48 = arith.constant 0 : index
    %107 = vector.load %arg11[%c0_47, %c0_48] : memref<8x1xf32, #tpu.memory_space<vmem>>, vector<8x1xf32>
    %108 = vector.broadcast %107 : vector<8x1xf32> to vector<8x1024xf32>
    %109 = arith.addf %106, %108 : vector<8x1024xf32>
    %cst_49 = arith.constant 0.000000e+00 : f32
    %110 = vector.broadcast %cst_49 : f32 to vector<8x1024xf32>
    %111 = arith.maximumf %109, %110 : vector<8x1024xf32>
    %c0_50 = arith.constant 0 : index
    %c0_51 = arith.constant 0 : index
    %112 = vector.load %arg12[%c0_50, %c0_51] : memref<1x8xf32, #tpu.memory_space<vmem>>, vector<1x8xf32>
    %cst_52 = arith.constant dense<0.000000e+00> : vector<1x1024xf32>
    %113 = tpu.matmul %112, %111, %cst_52 {dimension_numbers = #tpu.dot_dimension_numbers<[1], [0], [0], [1], [0, 0, 1, 1], [], []>} : vector<1x8xf32>, vector<8x1024xf32>, vector<1x1024xf32> -> vector<1x1024xf32>
    %c0_53 = arith.constant 0 : index
    %c0_54 = arith.constant 0 : index
    %114 = vector.load %arg13[%c0_53, %c0_54] : memref<1x1xf32, #tpu.memory_space<vmem>>, vector<1x1xf32>
    %115 = vector.broadcast %114 : vector<1x1xf32> to vector<1x1024xf32>
    %116 = arith.addf %113, %115 : vector<1x1024xf32>
    %c0_55 = arith.constant 0 : index
    %c0_56 = arith.constant 0 : index
    %c0_57 = arith.constant 0 : index
    %117 = vector.load %arg14[%c0_55, %c0_56, %c0_57] : memref<1x1x1024xf32, #tpu.memory_space<vmem>>, vector<1x1x1024xf32>
    %118 = vector.shape_cast %117 : vector<1x1x1024xf32> to vector<1x1024xf32>
    %119 = vector.shape_cast %116 : vector<1x1024xf32> to vector<1x1x1024xf32>
    tpu.vector_store %arg14[%c0_55, %c0_56, %c0_57], %119 {strides = array<i32>} : memref<1x1x1024xf32, #tpu.memory_space<vmem>>, vector<1x1x1024xf32>,
    return
  }
  func.func @transform_0(%arg0: i32) -> (i32, i32, i32) {
    %c0_i32 = arith.constant 0 : i32
    %c0_i32_0 = arith.constant 0 : i32
    %c0_i32_1 = arith.constant 0 : i32
    return %arg0, %c0_i32, %c0_i32_0 : i32, i32, i32
  }
  func.func @transform_1(%arg0: i32) -> (i32, i32) {
    %c0_i32 = arith.constant 0 : i32
    %c0_i32_0 = arith.constant 0 : i32
    %c0_i32_1 = arith.constant 0 : i32
    return %c0_i32, %c0_i32_0 : i32, i32
  }
  func.func @transform_2(%arg0: i32) -> (i32, i32) {
    %c0_i32 = arith.constant 0 : i32
    %c0_i32_0 = arith.constant 0 : i32
    %c0_i32_1 = arith.constant 0 : i32
    return %c0_i32, %c0_i32_0 : i32, i32
  }
  func.func @transform_3(%arg0: i32) -> (i32, i32) {
    %c0_i32 = arith.constant 0 : i32
    %c0_i32_0 = arith.constant 0 : i32
    %c0_i32_1 = arith.constant 0 : i32
    return %c0_i32, %c0_i32_0 : i32, i32
  }
  func.func @transform_4(%arg0: i32) -> (i32, i32) {
    %c0_i32 = arith.constant 0 : i32
    %c0_i32_0 = arith.constant 0 : i32
    %c0_i32_1 = arith.constant 0 : i32
    return %c0_i32, %c0_i32_0 : i32, i32
  }
  func.func @transform_5(%arg0: i32) -> (i32, i32) {
    %c0_i32 = arith.constant 0 : i32
    %c0_i32_0 = arith.constant 0 : i32
    %c0_i32_1 = arith.constant 0 : i32
    return %c0_i32, %c0_i32_0 : i32, i32
  }
  func.func @transform_6(%arg0: i32) -> (i32, i32) {
    %c0_i32 = arith.constant 0 : i32
    %c0_i32_0 = arith.constant 0 : i32
    %c0_i32_1 = arith.constant 0 : i32
    return %c0_i32, %c0_i32_0 : i32, i32
  }
  func.func @transform_7(%arg0: i32) -> (i32, i32) {
    %c0_i32 = arith.constant 0 : i32
    %c0_i32_0 = arith.constant 0 : i32
    %c0_i32_1 = arith.constant 0 : i32
    return %c0_i32, %c0_i32_0 : i32, i32
  }
  func.func @transform_8(%arg0: i32) -> (i32, i32) {
    %c0_i32 = arith.constant 0 : i32
    %c0_i32_0 = arith.constant 0 : i32
    %c0_i32_1 = arith.constant 0 : i32
    return %c0_i32, %c0_i32_0 : i32, i32
  }
  func.func @transform_9(%arg0: i32) -> (i32, i32) {
    %c0_i32 = arith.constant 0 : i32
    %c0_i32_0 = arith.constant 0 : i32
    %c0_i32_1 = arith.constant 0 : i32
    return %c0_i32, %c0_i32_0 : i32, i32
  }
  func.func @transform_10(%arg0: i32) -> (i32, i32) {
    %c0_i32 = arith.constant 0 : i32
    %c0_i32_0 = arith.constant 0 : i32
    %c0_i32_1 = arith.constant 0 : i32
    return %c0_i32, %c0_i32_0 : i32, i32
  }
  func.func @transform_11(%arg0: i32) -> (i32, i32) {
    %c0_i32 = arith.constant 0 : i32
    %c0_i32_0 = arith.constant 0 : i32
    %c0_i32_1 = arith.constant 0 : i32
    return %c0_i32, %c0_i32_0 : i32, i32
  }
  func.func @transform_12(%arg0: i32) -> (i32, i32) {
    %c0_i32 = arith.constant 0 : i32
    %c0_i32_0 = arith.constant 0 : i32
    %c0_i32_1 = arith.constant 0 : i32
    return %c0_i32, %c0_i32_0 : i32, i32
  }
  func.func @transform_13(%arg0: i32) -> (i32, i32, i32) {
    %c0_i32 = arith.constant 0 : i32
    %c0_i32_0 = arith.constant 0 : i32
    %c0_i32_1 = arith.constant 0 : i32
    return %arg0, %c0_i32, %c0_i32_0 : i32, i32, i32
  }
}

</mosaic_0001>

<bundles_post_ra>
// kernel: tpu_custom_call.1
= control target key start
LH: loop header
LB: loop body
LE: loop exit
PB: predicated region body
PF: predicated region fallthrough
CT: control target
= control target key end

     0   :  { %s3681_s0 = inlined_call_operand.vmem [shape: f32[1,8,128], index: 0, kind: input, shape index: {}]   ;;  %s3682_s1 = inlined_call_operand.vmem [shape: f32[32,1], index: 1, kind: input, shape index: {}]   ;;  %s3683_s2 = inlined_call_operand.vmem [shape: f32[32,32], index: 2, kind: input, shape index: {}]   ;;  %s3684_s3 = inlined_call_operand.vmem [shape: f32[32,1], index: 3, kind: input, shape index: {}]   ;;  %s3685_s4 = inlined_call_operand.vmem [shape: f32[32,1], index: 4, kind: input, shape index: {}]   ;;  %s3686_s5 = inlined_call_operand.vmem [shape: f32[32,32], index: 5, kind: input, shape index: {}]   ;;  %s3687_s6 = inlined_call_operand.vmem [shape: f32[32,1], index: 6, kind: input, shape index: {}]   ;;  %s3688_s7 = inlined_call_operand.vmem [shape: f32[16,32], index: 7, kind: input, shape index: {}]   ;;  %s3689_s8 = inlined_call_operand.vmem [shape: f32[16,1], index: 8, kind: input, shape index: {}]   ;;  %s3690_s9 = inlined_call_operand.vmem [shape: f32[8,16], index: 9, kind: input, shape index: {}]   ;;  %s3691_s10 = inlined_call_operand.vmem [shape: f32[8,1], index: 10, kind: input, shape index: {}]   ;;  %s3692_s11 = inlined_call_operand.vmem [shape: f32[1,8], index: 11, kind: input, shape index: {}]   ;;  %s3693_s12 = inlined_call_operand.<no memory space> [shape: f32[1,1], index: 12, kind: input, shape index: {}]   ;;  %s3694_s13 = inlined_call_operand.hbm [shape: f32[1,1,1024], index: 13, kind: output, shape index: {}]  }
   0x1   :  { %v18_v0 = vstv %s3693_s12 }
   0x2   :  { %19 = vst [vmem:[#allocation2] sm:$0x1] %v18_v0 }
   0x3   :  { %v2906_v1 = vld [vmem:[%s3683_s2] sm:$0xff]  ;;  %vm112_vm0 = vcmask 261120   ;;  %v2911_v2 = vld [vmem:[%s3683_s2 + $0x8] sm:$0xff]  ;;  %v3695_v3 = vmov 0.0   ;;  %v2919_v4 = vld [vmem:[%s3683_s2 + $0x10] sm:$0xff]  ;;  %v2827_v6 = vmov 0  }
   0x4   :  { %2628 = vmatprep.subr.mxu0 %v3695_v3  ;;  %2630 = vmatprep.mubr.msk.f32.mxu0 %vm112_vm0, %v2906_v1  ;;  %v50_v5 = vld [vmem:[%s3682_s1 + $0x18] sm:$0xff]  ;;  %v49_v9 = vld [vmem:[%s3682_s1 + $0x10] sm:$0xff]  ;;  %v48_v10 = vld [vmem:[%s3682_s1 + $0x8] sm:$0xff] }
   0x5   :  { %2629 = vmatpush3.msra.mxu0 %v3695_v3  ;;  %2738 = vset.pattern.permute.xlu0 %v2827_v6  ;;  %v58_v7 = vld [vmem:[%s3684_s3 + $0x18] sm:$0xff]  ;;  %v57_v11 = vld [vmem:[%s3684_s3 + $0x10] sm:$0xff] }
   0x6   :  { %2631 = vmatmul.mubr.msk.f32.vlgmr.msra.gmra.mxu0 %vm112_vm0, %v2911_v2  ;;  %77 = vperm.xlu0 %2738, %v50_v5   ;;  %v2935_v8 = vld [vmem:[%s3683_s2 + $0x18] sm:$0xff] }
   0x7   :  { %2633 = vmatprep.mubr.msk.f32.mxu0 %vm112_vm0, %v2919_v4  ;;  %2739 = vset.pattern.permute.xlu1 %v2827_v6 }
   0x8   :  { %105 = vperm.xlu1 %2739, %v58_v7   ;;  %2644 = vmatprep.mubr.msk.f32.mxu1 %vm112_vm0, %v2906_v1 }
   0xa   :  { %2634 = vmatmul.mubr.msk.f32.gmra.mxu0 %vm112_vm0, %v2935_v8  ;;  %72 = vperm.xlu0 %2738, %v49_v9  }
   0xb   :  { %2658 = vmatprep.mubr.msk.f32.mxu0 %vm112_vm0, %v2906_v1 }
   0xc   :  { %20 = vsyncpa [#allocation4], 0  ;;  %67 = vperm.xlu1 %2739, %v48_v10   ;;  %v47_v12 = vld [vmem:[%s3682_s1] sm:$0xff]  ;;  %v56_v13 = vld [vmem:[%s3684_s3 + $0x8] sm:$0xff]  ;;  %vm1827_vm1 = vcmask 130048   ;;  %vm2134_vm2 = vcmask 64512  }
   0xd   :  { %v55_v14 = vld [vmem:[%s3684_s3] sm:$0xff]  ;;  %v967_v15 = vld [vmem:[%s3685_s4 + $0x18] sm:$0xff]  ;;  %v966_v16 = vld [vmem:[%s3685_s4 + $0x10] sm:$0xff] }
   0xe   :  { %100 = vperm.xlu0 %2738, %v57_v11   ;;  %v965_v17 = vld [vmem:[%s3685_s4 + $0x8] sm:$0xff]  ;;  %v1391_v18 = vld [vmem:[%s3687_s6 + $0x18] sm:$0xff]  ;;  %v964_v19 = vld [vmem:[%s3685_s4] sm:$0xff] }
   0xf   :  { %v1390_v20 = vld [vmem:[%s3687_s6 + $0x10] sm:$0xff]  ;;  %v1389_v21 = vld [vmem:[%s3687_s6 + $0x8] sm:$0xff]  ;;  %v1388_v22 = vld [vmem:[%s3687_s6] sm:$0xff] }
  0x10   :  { %62 = vperm.xlu1 %2739, %v47_v12   ;;  %v1479_v23 = vld [vmem:[%s3689_s8 + $0x8] sm:$0xff]  ;;  %v1478_v24 = vld [vmem:[%s3689_s8] sm:$0xff] }
  0x11   :  { %v1821_v25 = vld [vmem:[%s3691_s10] sm:$0xff] }
  0x12   :  { %95 = vperm.xlu0 %2738, %v56_v13   ;;  %v2124_v26 = vld [vmem:[#allocation2] sm:$0x1]  ;;  %v2997_v27 = vld [vmem:[%s3681_s0 + $0x1] ss:$0 sm:$0xff]  ;;  %v3004_v29 = vld [vmem:[%s3681_s0 + $0x2] ss:$0 sm:$0xff] }
  0x13   :  { %v3009_v30 = vld [vmem:[%s3681_s0 + $0x3] ss:$0 sm:$0xff]  ;;  %v3014_v31 = vld [vmem:[%s3681_s0 + $0x4] ss:$0 sm:$0xff]  ;;  %v3025_v35 = vld [vmem:[%s3681_s0 + $0x5] ss:$0 sm:$0xff] }
  0x14   :  { %90 = vperm.xlu1 %2739, %v55_v14   ;;  %v3030_v36 = vld [vmem:[%s3681_s0 + $0x6] ss:$0 sm:$0xff]  ;;  %v3035_v37 = vld [vmem:[%s3681_s0 + $0x7] ss:$0 sm:$0xff] }
  0x16   :  { %985 = vperm.xlu0 %2738, %v967_v15  }
  0x18   :  { %980 = vperm.xlu1 %2739, %v966_v16  }
  0x1a   :  { %975 = vperm.xlu0 %2738, %v965_v17  }
  0x1c   :  { %1409 = vperm.xlu1 %2739, %v1391_v18  }
  0x1e   :  { %970 = vperm.xlu0 %2738, %v964_v19  }
  0x20   :  { %1404 = vperm.xlu1 %2739, %v1390_v20  }
  0x22   :  { %1399 = vperm.xlu0 %2738, %v1389_v21  }
  0x24   :  { %1394 = vperm.xlu1 %2739, %v1388_v22  }
  0x26   :  { %1487 = vperm.xlu0 %2738, %v1479_v23  }
  0x28   :  { %1482 = vperm.xlu1 %2739, %v1478_v24  }
  0x2a   :  { %1824 = vperm.xlu0 %2738, %v1821_v25  }
  0x2c   :  { %2127 = vperm.xlu1 %2739, %v2124_v26  }
  0x81   :  { %v2999_v28 = vpop.permute.xlu0 %77 }
  0x82   :  { %v226_v32 = vmul.f32 %v2997_v27, %v2999_v28  ;;  %v332_v33 = vmul.f32 %v3004_v29, %v2999_v28  ;;  %v438_v34 = vmul.f32 %v3009_v30, %v2999_v28  ;;  %v544_v39 = vmul.f32 %v3014_v31, %v2999_v28 }
  0x83   :  { %v3037_v38 = vpop.permute.xlu1 %105  ;;  %v650_v40 = vmul.f32 %v3025_v35, %v2999_v28  ;;  %v756_v41 = vmul.f32 %v3030_v36, %v2999_v28  ;;  %v862_v42 = vmul.f32 %v3035_v37, %v2999_v28 }
  0x84   :  { %v3048_v43 = vadd.f32 %v226_v32, %v3037_v38  ;;  %v3051_v44 = vadd.f32 %v332_v33, %v3037_v38  ;;  %v3054_v45 = vadd.f32 %v438_v34, %v3037_v38  ;;  %v3059_v47 = vadd.f32 %v544_v39, %v3037_v38 }
  0x85   :  { %v3056_v46 = vpop.permute.xlu0 %72  ;;  %v3062_v48 = vadd.f32 %v650_v40, %v3037_v38  ;;  %v3065_v49 = vadd.f32 %v756_v41, %v3037_v38  ;;  %v3068_v50 = vadd.f32 %v862_v42, %v3037_v38 }
  0x86   :  { %v225_v51 = vmul.f32 %v2997_v27, %v3056_v46  ;;  %v331_v52 = vmul.f32 %v3004_v29, %v3056_v46  ;;  %v437_v53 = vmul.f32 %v3009_v30, %v3056_v46  ;;  %v543_v55 = vmul.f32 %v3014_v31, %v3056_v46 }
  0x87   :  { %v3076_v54 = vpop.permute.xlu1 %67  ;;  %v649_v56 = vmul.f32 %v3025_v35, %v3056_v46  ;;  %v755_v57 = vmul.f32 %v3030_v36, %v3056_v46  ;;  %v861_v58 = vmul.f32 %v3035_v37, %v3056_v46 }
  0x88   :  { %v224_v59 = vmul.f32 %v2997_v27, %v3076_v54  ;;  %v330_v60 = vmul.f32 %v3004_v29, %v3076_v54  ;;  %v436_v62 = vmul.f32 %v3009_v30, %v3076_v54  ;;  %v542_v63 = vmul.f32 %v3014_v31, %v3076_v54 }
  0x89   :  { %v3090_v61 = vpop.permute.xlu0 %100  ;;  %v648_v0 = vmul.f32 %v3025_v35, %v3076_v54  ;;  %v754_v5 = vmul.f32 %v3030_v36, %v3076_v54  ;;  %v860_v10 = vmul.f32 %v3035_v37, %v3076_v54 }
  0x8a   :  { %v3101_v6 = vadd.f32 %v225_v51, %v3090_v61  ;;  %v3104_v7 = vadd.f32 %v331_v52, %v3090_v61  ;;  %v3107_v9 = vadd.f32 %v437_v53, %v3090_v61  ;;  %v3112_v12 = vadd.f32 %v543_v55, %v3090_v61 }
  0x8b   :  { %v63_v11 = vpop.permute.xlu1 %62  ;;  %v3115_v13 = vadd.f32 %v649_v56, %v3090_v61  ;;  %v3118_v14 = vadd.f32 %v755_v57, %v3090_v61  ;;  %v3121_v15 = vadd.f32 %v861_v58, %v3090_v61 }
  0x8c   :  { %v223_v16 = vmul.f32 %v2997_v27, %v63_v11  ;;  %v329_v17 = vmul.f32 %v3004_v29, %v63_v11  ;;  %v435_v18 = vmul.f32 %v3009_v30, %v63_v11  ;;  %v541_v20 = vmul.f32 %v3014_v31, %v63_v11 }
  0x8d   :  { %v96_v19 = vpop.permute.xlu0 %95  ;;  %v647_v21 = vmul.f32 %v3025_v35, %v63_v11  ;;  %v753_v22 = vmul.f32 %v3030_v36, %v63_v11  ;;  %v859_v23 = vmul.f32 %v3035_v37, %v63_v11 }
  0x8e   :  { %v3130_v24 = vadd.f32 %v224_v59, %v96_v19  ;;  %v3132_v25 = vadd.f32 %v330_v60, %v96_v19  ;;  %v3134_v26 = vadd.f32 %v436_v62, %v96_v19  ;;  %v3136_v33 = vadd.f32 %v542_v63, %v96_v19 }
  0x8f   :  { %v91_v32 = vpop.permute.xlu1 %90  ;;  %v3138_v34 = vadd.f32 %v648_v0, %v96_v19  ;;  %v3140_v39 = vadd.f32 %v754_v5, %v96_v19  ;;  %v3142_v40 = vadd.f32 %v860_v10, %v96_v19 }
  0x90   :  { %v3144_v41 = vadd.f32 %v223_v16, %v91_v32  ;;  %v3146_v42 = vadd.f32 %v329_v17, %v91_v32  ;;  %v3148_v51 = vadd.f32 %v435_v18, %v91_v32  ;;  %v3152_v53 = vadd.f32 %v541_v20, %v91_v32 }
  0x91   :  { %v3150_v52 = vpop.permute.xlu0 %985  ;;  %v3154_v55 = vadd.f32 %v647_v21, %v91_v32  ;;  %v3156_v56 = vadd.f32 %v753_v22, %v91_v32  ;;  %v3158_v57 = vadd.f32 %v859_v23, %v91_v32 }
  0x92   :  { %v3162_v58 = vmul.f32 %v3004_v29, %v3150_v52  ;;  %v3166_v59 = vmul.f32 %v3009_v30, %v3150_v52  ;;  %v3170_v60 = vmul.f32 %v3030_v36, %v3150_v52  ;;  %v3174_v62 = vmul.f32 %v3035_v37, %v3150_v52 }
  0x93   :  { %v3176_v63 = vpop.permute.xlu1 %980 }
  0x94   :  { %3697 = vst [vmem:[#allocation6_spill] sm:$0xff] %v3162_v58  ;;  %3698 = vst [vmem:[#allocation7_spill] sm:$0xff] %v3166_v59  ;;  %v3182_v5 = vmul.f32 %v3004_v29, %v3176_v63  ;;  %v3186_v10 = vmul.f32 %v3009_v30, %v3176_v63  ;;  %v3190_v16 = vmul.f32 %v3030_v36, %v3176_v63 }
  0x95   :  { %3699 = vst [vmem:[#allocation8_spill] sm:$0xff] %v3170_v60  ;;  %3700 = vst [vmem:[#allocation9_spill] sm:$0xff] %v3174_v62  ;;  %v3178_v0 = vpop.permute.xlu0 %975  ;;  %v3194_v17 = vmul.f32 %v3035_v37, %v3176_v63 }
  0x96   :  { %3701 = vst [vmem:[#allocation10_spill] sm:$0xff] %v3182_v5  ;;  %3702 = vst [vmem:[#allocation11_spill] sm:$0xff] %v3190_v16  ;;  %v3198_v18 = vmul.f32 %v3004_v29, %v3178_v0  ;;  %v3202_v20 = vmul.f32 %v3009_v30, %v3178_v0  ;;  %v3206_v21 = vmul.f32 %v3030_v36, %v3178_v0 }
  0x97   :  { %3703 = vst [vmem:[#allocation12_spill] sm:$0xff] %v3194_v17  ;;  %v3210_v22 = vmul.f32 %v3035_v37, %v3178_v0 }
  0x98   :  { %3704 = vst [vmem:[#allocation13_spill] sm:$0xff] %v3198_v18  ;;  %3705 = vst [vmem:[#allocation14_spill] sm:$0xff] %v3202_v20 }
  0x99   :  { %3706 = vst [vmem:[#allocation15_spill] sm:$0xff] %v3206_v21  ;;  %3707 = vst [vmem:[#allocation16_spill] sm:$0xff] %v3210_v22  ;;  %v3212_v23 = vpop.permute.xlu0 %970  ;;  %v3233_v22 = vld [vmem:[%s3681_s0] ss:$0 sm:$0xff] }
  0x9a   :  { %v3216_v3 = vmul.f32 %v3004_v29, %v3212_v23  ;;  %v3220_v62 = vmul.f32 %v3009_v30, %v3212_v23  ;;  %v3224_v16 = vmul.f32 %v3030_v36, %v3212_v23  ;;  %v3228_v21 = vmul.f32 %v3035_v37, %v3212_v23 }
  0x9b   :  { %v87_v29 = vmul.f32 %v3233_v22, %v2999_v28  ;;  %v85_v30 = vmul.f32 %v3233_v22, %v3076_v54  ;;  %v86_v36 = vmul.f32 %v3233_v22, %v3056_v46  ;;  %v84_v17 = vmul.f32 %v3233_v22, %v63_v11 }
  0x9c   :  { %3708 = vst [vmem:[#allocation17_spill] sm:$0xff] %v3216_v3  ;;  %3709 = vst [vmem:[#allocation18_spill] sm:$0xff] %v3220_v62 }
  0x9d   :  { %3710 = vst [vmem:[#allocation19_spill] sm:$0xff] %v3224_v16  ;;  %3711 = vst [vmem:[#allocation20_spill] sm:$0xff] %v3228_v21  ;;  %v111_v37 = vadd.f32 %v3037_v38, %v87_v29  ;;  %v109_v3 = vadd.f32 %v96_v19, %v85_v30  ;;  %v110_v18 = vadd.f32 %v3090_v61, %v86_v36 }
  0x9e   :  { %v108_v28 = vadd.f32 %v91_v32, %v84_v17 }
  0xc6   :  { %v2632_v60 = vpop.f32.mrf.mxu0 }
  0xc7   :  { %v211_v20 = vadd.f32 %v2632_v60, %v109_v3 }
  0xc8   :  { %v191_v16 = vpop.f32.mrf.mxu0 }
  0xc9   :  { %v210_v58 = vadd.f32 %v191_v16, %v108_v28 }
  0xca   :  { %v2635_v21 = vpop.f32.mrf.mxu0 }
  0xcb   :  { %v213_v62 = vadd.f32 %v2635_v21, %v111_v37 }
  0xcc   :  { %v201_v59 = vpop.f32.mrf.mxu0 }
  0xcd   :  { %2740 = vtanh.f32 %v213_v62  ;;  %v212_v5 = vadd.f32 %v201_v59, %v110_v18 }
  0xcf   :  { %2742 = vtanh.f32 %v212_v5 }
  0xd0   :  { %2744 = vtanh.f32 %v211_v20 }
  0xd1   :  { %2746 = vtanh.f32 %v210_v58 }
  0xda   :  { %v3244_v46 = vpop.eup %2740 }
  0xdb   :  { %2636 = vmatprep.subr.mxu1 %v3244_v46 }
  0xdc   :  { %v3247_v54 = vpop.eup %2742  ;;  %2637 = vmatpush3.msra.mxu1 %v3244_v46 }
  0xdd   :  { %2638 = vmatprep.subr.mxu1 %v3247_v54  ;;  %v3251_v38 = vpop.eup %2744 }
  0xde   :  { %2639 = vmatpush3.msra.mxu1 %v3247_v54  ;;  %v3255_v3 = vpop.eup %2746 }
  0xdf   :  { %2640 = vmatprep.subr.mxu1 %v3251_v38 }
  0xe0   :  { %2641 = vmatpush3.msra.mxu1 %v3251_v38 }
  0xe1   :  { %2642 = vmatprep.subr.mxu1 %v3255_v3 }
  0xe2   :  { %2643 = vmatpush3.msra.mxu1 %v3255_v3 }
  0xe3   :  { %2645 = vmatmul.mubr.msk.f32.vlgmr.msra.gmra.mxu1 %vm112_vm0, %v2911_v2 }
  0xe4   :  { %2647 = vmatprep.mubr.msk.f32.mxu1 %vm112_vm0, %v2919_v4 }
  0xe7   :  { %2648 = vmatmul.mubr.msk.f32.gmra.mxu1 %vm112_vm0, %v2935_v8 }
  0xe8   :  { %2672 = vmatprep.mubr.msk.f32.mxu1 %vm112_vm0, %v2906_v1 }
 0x1a3   :  { %v2646_v61 = vpop.f32.mrf.mxu1 }
 0x1a4   :  { %v317_v59 = vadd.f32 %v2646_v61, %v3130_v24 }
 0x1a5   :  { %v297_v11 = vpop.f32.mrf.mxu1 }
 0x1a6   :  { %v316_v62 = vadd.f32 %v297_v11, %v3144_v41 }
 0x1a7   :  { %v2649_v19 = vpop.f32.mrf.mxu1 }
 0x1a8   :  { %v319_v32 = vadd.f32 %v2649_v19, %v3048_v43 }
 0x1a9   :  { %v307_v58 = vpop.f32.mrf.mxu1 }
 0x1aa   :  { %2748 = vtanh.f32 %v319_v32  ;;  %v318_v60 = vadd.f32 %v307_v58, %v3101_v6 }
 0x1ac   :  { %2750 = vtanh.f32 %v318_v60 }
 0x1ad   :  { %2752 = vtanh.f32 %v317_v59 }
 0x1ae   :  { %2754 = vtanh.f32 %v316_v62 }
 0x1b7   :  { %v3272_v5 = vpop.eup %2748 }
 0x1b8   :  { %2650 = vmatprep.subr.mxu0 %v3272_v5 }
 0x1b9   :  { %v3275_v16 = vpop.eup %2750  ;;  %2651 = vmatpush3.msra.mxu0 %v3272_v5 }
 0x1ba   :  { %2652 = vmatprep.subr.mxu0 %v3275_v16  ;;  %v3279_v43 = vpop.eup %2752 }
 0x1bb   :  { %2653 = vmatpush3.msra.mxu0 %v3275_v16  ;;  %v3283_v6 = vpop.eup %2754 }
 0x1bc   :  { %2654 = vmatprep.subr.mxu0 %v3279_v43 }
 0x1bd   :  { %2655 = vmatpush3.msra.mxu0 %v3279_v43 }
 0x1be   :  { %2656 = vmatprep.subr.mxu0 %v3283_v6 }
 0x1bf   :  { %2657 = vmatpush3.msra.mxu0 %v3283_v6 }
 0x1c0   :  { %2659 = vmatmul.mubr.msk.f32.vlgmr.msra.gmra.mxu0 %vm112_vm0, %v2911_v2 }
 0x1c1   :  { %2661 = vmatprep.mubr.msk.f32.mxu0 %vm112_vm0, %v2919_v4 }
 0x1c4   :  { %2662 = vmatmul.mubr.msk.f32.gmra.mxu0 %vm112_vm0, %v2935_v8 }
 0x1c5   :  { %2686 = vmatprep.mubr.msk.f32.mxu0 %vm112_vm0, %v2906_v1 }
 0x280   :  { %v2660_v24 = vpop.f32.mrf.mxu0 }
 0x281   :  { %v423_v21 = vadd.f32 %v2660_v24, %v3132_v25 }
 0x282   :  { %v403_v41 = vpop.f32.mrf.mxu0 }
 0x283   :  { %v422_v30 = vadd.f32 %v403_v41, %v3146_v42 }
 0x284   :  { %v2663_v17 = vpop.f32.mrf.mxu0 }
 0x285   :  { %v425_v18 = vadd.f32 %v2663_v17, %v3051_v44 }
 0x286   :  { %v413_v20 = vpop.f32.mrf.mxu0 }
 0x287   :  { %2756 = vtanh.f32 %v425_v18  ;;  %v424_v29 = vadd.f32 %v413_v20, %v3104_v7 }
 0x289   :  { %2758 = vtanh.f32 %v424_v29 }
 0x28a   :  { %2760 = vtanh.f32 %v423_v21 }
 0x28b   :  { %2762 = vtanh.f32 %v422_v30 }
 0x294   :  { %v3300_v36 = vpop.eup %2756 }
 0x295   :  { %2664 = vmatprep.subr.mxu1 %v3300_v36 }
 0x296   :  { %v3303_v37 = vpop.eup %2758  ;;  %2665 = vmatpush3.msra.mxu1 %v3300_v36 }
 0x297   :  { %2666 = vmatprep.subr.mxu1 %v3303_v37  ;;  %v3307_v44 = vpop.eup %2760 }
 0x298   :  { %2667 = vmatpush3.msra.mxu1 %v3303_v37  ;;  %v3311_v7 = vpop.eup %2762 }
 0x299   :  { %2668 = vmatprep.subr.mxu1 %v3307_v44 }
 0x29a   :  { %2669 = vmatpush3.msra.mxu1 %v3307_v44 }
 0x29b   :  { %2670 = vmatprep.subr.mxu1 %v3311_v7 }
 0x29c   :  { %2671 = vmatpush3.msra.mxu1 %v3311_v7 }
 0x29d   :  { %2673 = vmatmul.mubr.msk.f32.vlgmr.msra.gmra.mxu1 %vm112_vm0, %v2911_v2 }
 0x29e   :  { %2675 = vmatprep.mubr.msk.f32.mxu1 %vm112_vm0, %v2919_v4 }
 0x2a1   :  { %2676 = vmatmul.mubr.msk.f32.gmra.mxu1 %vm112_vm0, %v2935_v8 }
 0x2a2   :  { %2700 = vmatprep.mubr.msk.f32.mxu1 %vm112_vm0, %v2906_v1 }
 0x35d   :  { %v2674_v25 = vpop.f32.mrf.mxu1 }
 0x35e   :  { %v529_v19 = vadd.f32 %v2674_v25, %v3134_v26 }
 0x35f   :  { %v509_v42 = vpop.f32.mrf.mxu1 }
 0x360   :  { %v528_v58 = vadd.f32 %v509_v42, %v3148_v51 }
 0x361   :  { %v2677_v28 = vpop.f32.mrf.mxu1 }
 0x362   :  { %v531_v61 = vadd.f32 %v2677_v28, %v3054_v45 }
 0x363   :  { %v519_v11 = vpop.f32.mrf.mxu1 }
 0x364   :  { %2764 = vtanh.f32 %v531_v61  ;;  %v530_v32 = vadd.f32 %v519_v11, %v3107_v9 }
 0x366   :  { %2766 = vtanh.f32 %v530_v32 }
 0x367   :  { %2768 = vtanh.f32 %v529_v19 }
 0x368   :  { %2770 = vtanh.f32 %v528_v58 }
 0x371   :  { %v3328_v59 = vpop.eup %2764 }
 0x372   :  { %2678 = vmatprep.subr.mxu0 %v3328_v59 }
 0x373   :  { %v3331_v60 = vpop.eup %2766  ;;  %2679 = vmatpush3.msra.mxu0 %v3328_v59 }
 0x374   :  { %2680 = vmatprep.subr.mxu0 %v3331_v60  ;;  %v3335_v45 = vpop.eup %2768 }
 0x375   :  { %2681 = vmatpush3.msra.mxu0 %v3331_v60  ;;  %v3339_v9 = vpop.eup %2770 }
 0x376   :  { %2682 = vmatprep.subr.mxu0 %v3335_v45 }
 0x377   :  { %2683 = vmatpush3.msra.mxu0 %v3335_v45 }
 0x378   :  { %2684 = vmatprep.subr.mxu0 %v3339_v9 }
 0x379   :  { %2685 = vmatpush3.msra.mxu0 %v3339_v9 }
 0x37a   :  { %2687 = vmatmul.mubr.msk.f32.vlgmr.msra.gmra.mxu0 %vm112_vm0, %v2911_v2 }
 0x37b   :  { %2689 = vmatprep.mubr.msk.f32.mxu0 %vm112_vm0, %v2919_v4 }
 0x37e   :  { %2690 = vmatmul.mubr.msk.f32.gmra.mxu0 %vm112_vm0, %v2935_v8 }
 0x37f   :  { %2714 = vmatprep.mubr.msk.f32.mxu0 %vm112_vm0, %v2906_v1 }
 0x43a   :  { %v2688_v26 = vpop.f32.mrf.mxu0 }
 0x43b   :  { %v635_v17 = vadd.f32 %v2688_v26, %v3136_v33 }
 0x43c   :  { %v615_v51 = vpop.f32.mrf.mxu0 }
 0x43d   :  { %v634_v20 = vadd.f32 %v615_v51, %v3152_v53 }
 0x43e   :  { %v2691_v62 = vpop.f32.mrf.mxu0 }
 0x43f   :  { %v637_v24 = vadd.f32 %v2691_v62, %v3059_v47 }
 0x440   :  { %v625_v41 = vpop.f32.mrf.mxu0 }
 0x441   :  { %2772 = vtanh.f32 %v637_v24  ;;  %v636_v18 = vadd.f32 %v625_v41, %v3112_v12 }
 0x443   :  { %2774 = vtanh.f32 %v636_v18  ;;  %v3431_v18 = vpop.permute.xlu1 %1409 }
 0x444   :  { %2776 = vtanh.f32 %v635_v17 }
 0x445   :  { %2778 = vtanh.f32 %v634_v20 }
 0x44e   :  { %v2773_v21 = vpop.eup %2772 }
 0x44f   :  { %2692 = vmatprep.subr.mxu1 %v2773_v21 }
 0x450   :  { %v2775_v29 = vpop.eup %2774  ;;  %2693 = vmatpush3.msra.mxu1 %v2773_v21 }
 0x451   :  { %2694 = vmatprep.subr.mxu1 %v2775_v29  ;;  %v2777_v30 = vpop.eup %2776 }
 0x452   :  { %2695 = vmatpush3.msra.mxu1 %v2775_v29  ;;  %v2779_v47 = vpop.eup %2778 }
 0x453   :  { %2696 = vmatprep.subr.mxu1 %v2777_v30 }
 0x454   :  { %2697 = vmatpush3.msra.mxu1 %v2777_v30 }
 0x455   :  { %2698 = vmatprep.subr.mxu1 %v2779_v47 }
 0x456   :  { %2699 = vmatpush3.msra.mxu1 %v2779_v47 }
 0x457   :  { %2701 = vmatmul.mubr.msk.f32.vlgmr.msra.gmra.mxu1 %vm112_vm0, %v2911_v2 }
 0x458   :  { %2703 = vmatprep.mubr.msk.f32.mxu1 %vm112_vm0, %v2919_v4 }
 0x45b   :  { %2704 = vmatmul.mubr.msk.f32.gmra.mxu1 %vm112_vm0, %v2935_v8 }
 0x45c   :  { %2728 = vmatprep.mubr.msk.f32.mxu1 %vm112_vm0, %v2906_v1 }
 0x517   :  { %v2702_v12 = vpop.f32.mrf.mxu1 }
 0x518   :  { %v741_v28 = vadd.f32 %v2702_v12, %v3138_v34  ;;  %v3384_v34 = vld [vmem:[%s3686_s5] sm:$0xff] }
 0x519   :  { %v721_v33 = vpop.f32.mrf.mxu1 }
 0x51a   :  { %v740_v11 = vadd.f32 %v721_v33, %v3154_v55  ;;  %v3394_v55 = vld [vmem:[%s3686_s5 + $0x8] sm:$0xff] }
 0x51b   :  { %v2705_v53 = vpop.f32.mrf.mxu1 }
 0x51c   :  { %v743_v25 = vadd.f32 %v2705_v53, %v3062_v48  ;;  %v997_v53 = vmul.f32 %v2997_v27, %v3178_v0 }
 0x51d   :  { %v731_v42 = vpop.f32.mrf.mxu1 }
 0x51e   :  { %2780 = vtanh.f32 %v743_v25  ;;  %v742_v61 = vadd.f32 %v731_v42, %v3115_v13  ;;  %v3712_v13 = vmov 0.0  }
 0x520   :  { %2782 = vtanh.f32 %v742_v61  ;;  %v3452_v61 = vpop.permute.xlu1 %1404 }
 0x521   :  { %2784 = vtanh.f32 %v741_v28 }
 0x522   :  { %2786 = vtanh.f32 %v740_v11  ;;  %v996_v11 = vmul.f32 %v3233_v22, %v3178_v0 }
 0x52b   :  { %v2781_v19 = vpop.eup %2780 }
 0x52c   :  { %2706 = vmatprep.subr.mxu0 %v2781_v19 }
 0x52d   :  { %v2783_v32 = vpop.eup %2782  ;;  %2707 = vmatpush3.msra.mxu0 %v2781_v19 }
 0x52e   :  { %2708 = vmatprep.subr.mxu0 %v2783_v32  ;;  %v2785_v1 = vpop.eup %2784 }
 0x52f   :  { %2709 = vmatpush3.msra.mxu0 %v2783_v32  ;;  %v2787_v48 = vpop.eup %2786 }
 0x530   :  { %2710 = vmatprep.subr.mxu0 %v2785_v1 }
 0x531   :  { %2711 = vmatpush3.msra.mxu0 %v2785_v1 }
 0x532   :  { %2712 = vmatprep.subr.mxu0 %v2787_v48 }
 0x533   :  { %2713 = vmatpush3.msra.mxu0 %v2787_v48 }
 0x534   :  { %2715 = vmatmul.mubr.msk.f32.vlgmr.msra.gmra.mxu0 %vm112_vm0, %v2911_v2  ;;  %1056 = vmatprep.subr.mxu0 %v3272_v5 }
 0x535   :  { %1057 = vmatpush1.msra.mxu0 %v3244_v46  ;;  %2717 = vmatprep.mubr.msk.f32.mxu0 %vm112_vm0, %v2919_v4  ;;  %v3402_v46 = vld [vmem:[%s3686_s5 + $0x10] sm:$0xff] }
 0x536   :  { %1058 = vmatprep.subr.mxu0 %v3275_v16 }
 0x537   :  { %1059 = vmatpush1.msra.mxu0 %v3247_v54  ;;  %v3410_v54 = vld [vmem:[%s3686_s5 + $0x18] sm:$0xff] }
 0x538   :  { %2718 = vmatmul.mubr.msk.f32.gmra.mxu0 %vm112_vm0, %v2935_v8  ;;  %1060 = vmatprep.subr.mxu0 %v3279_v43 }
 0x539   :  { %1061 = vmatpush1.msra.mxu0 %v3251_v38  ;;  %1096 = vmatprep.mubr.f32.mxu0 %v3712_v13 }
 0x53a   :  { %1062 = vmatprep.subr.mxu0 %v3283_v6 }
 0x53b   :  { %1063 = vmatpush1.msra.mxu0 %v3255_v3 }
 0x53c   :  { %2535 = vmatmul.mubr.msk.f32.vlgmr.msra.gmra.mxu0 %vm112_vm0, %v3384_v34  ;;  %1234 = vmatprep.subr.mxu0 %v2781_v19 }
 0x53d   :  { %1235 = vmatpush1.msra.mxu0 %v2773_v21  ;;  %1102 = vmatprep.mubr.f32.mxu0 %v3712_v13 }
 0x53e   :  { %1236 = vmatprep.subr.mxu0 %v2783_v32  ;;  %v989_v32 = vmul.f32 %v2997_v27, %v3212_v23 }
 0x53f   :  { %1237 = vmatpush1.msra.mxu0 %v2775_v29 }
 0x540   :  { %2536 = vmatmul.mubr.msk.f32.gmra.mxu0 %vm112_vm0, %v3394_v55  ;;  %1238 = vmatprep.subr.mxu0 %v2785_v1 }
 0x541   :  { %1239 = vmatpush1.msra.mxu0 %v2777_v30  ;;  %1108 = vmatprep.mubr.f32.mxu0 %v3712_v13  ;;  %v1013_v30 = vmul.f32 %v2997_v27, %v3150_v52 }
 0x542   :  { %1240 = vmatprep.subr.mxu0 %v2787_v48 }
 0x543   :  { %1241 = vmatpush1.msra.mxu0 %v2779_v47 }
 0x544   :  { %2537 = vmatmul.mubr.msk.f32.gmra.mxu0 %vm112_vm0, %v3402_v46 }
 0x545   :  { %1114 = vmatprep.mubr.f32.mxu0 %v3712_v13 }
 0x548   :  { %2538 = vmatmul.mubr.msk.f32.gmra.mxu0 %vm112_vm0, %v3410_v54 }
 0x549   :  { %1274 = vmatprep.mubr.f32.mxu0 %v3712_v13 }
 0x54c   :  { %2543 = vmatmul.mubr.msk.f32.vlgmr.msra.gmra.mxu0 %vm112_vm0, %v3384_v34 }
 0x54d   :  { %1280 = vmatprep.mubr.f32.mxu0 %v3712_v13 }
 0x550   :  { %2544 = vmatmul.mubr.msk.f32.gmra.mxu0 %vm112_vm0, %v3394_v55 }
 0x551   :  { %1286 = vmatprep.mubr.f32.mxu0 %v3712_v13 }
 0x554   :  { %2545 = vmatmul.mubr.msk.f32.gmra.mxu0 %vm112_vm0, %v3402_v46 }
 0x555   :  { %1292 = vmatprep.mubr.f32.mxu0 %v3712_v13 }
 0x558   :  { %2546 = vmatmul.mubr.msk.f32.gmra.mxu0 %vm112_vm0, %v3410_v54 }
 0x559   :  { %1560 = vmatprep.mubr.f32.mxu0 %v3712_v13 }
 0x5f4   :  { %v2716_v38 = vpop.f32.mrf.mxu0 }
 0x5f5   :  { %v847_v6 = vadd.f32 %v2716_v38, %v3140_v39 }
 0x5f6   :  { %v827_v3 = vpop.f32.mrf.mxu0 }
 0x5f7   :  { %v846_v51 = vadd.f32 %v827_v3, %v3156_v56  ;;  %v1004_v56 = vmul.f32 %v3233_v22, %v3176_v63 }
 0x5f8   :  { %v2719_v5 = vpop.f32.mrf.mxu0 }
 0x5f9   :  { %v849_v16 = vadd.f32 %v2719_v5, %v3065_v49  ;;  %v1012_v49 = vmul.f32 %v3233_v22, %v3150_v52  ;;  %v988_v5 = vmul.f32 %v3233_v22, %v3212_v23 }
 0x5fa   :  { %v837_v43 = vpop.f32.mrf.mxu0 }
 0x5fb   :  { %2788 = vtanh.f32 %v849_v16  ;;  %v848_v58 = vadd.f32 %v837_v43, %v3118_v14  ;;  %v1005_v14 = vmul.f32 %v2997_v27, %v3176_v63 }
 0x5fc   :  { %v1098_v26 = vpop.f32.mrf.mxu0 }
 0x5fd   :  { %2790 = vtanh.f32 %v848_v58 }
 0x5fe   :  { %v1100_v62 = vpop.f32.mrf.mxu0  ;;  %2792 = vtanh.f32 %v847_v6 }
 0x5ff   :  { %2794 = vtanh.f32 %v846_v51  ;;  %v1101_v27 = vadd.f32 %v1100_v62, %v989_v32  ;;  %v3481_v62 = vpop.permute.xlu1 %1394  ;;  %v993_v32 = vmul.f32 %v3025_v35, %v3212_v23 }
 0x600   :  { %v1104_v24 = vpop.f32.mrf.mxu0 }
 0x601   :  { %v1105_v16 = vadd.f32 %v1104_v24, %v996_v11 }
 0x602   :  { %v1106_v41 = vpop.f32.mrf.mxu0 }
 0x603   :  { %v1107_v1 = vadd.f32 %v1106_v41, %v997_v53  ;;  %v3474_v41 = vpop.permute.xlu0 %1399  ;;  %v1001_v53 = vmul.f32 %v3025_v35, %v3178_v0 }
 0x604   :  { %v1110_v17 = vpop.f32.mrf.mxu0 }
 0x605   :  { %v1111_v25 = vadd.f32 %v1110_v17, %v1004_v56  ;;  %v1099_v17 = vadd.f32 %v1098_v26, %v988_v5  ;;  %v1421_v22 = vadd.f32 %v3474_v41, %v1107_v1  ;;  %v992_v1 = vmul.f32 %v3014_v31, %v3212_v23 }
 0x606   :  { %v1112_v20 = vpop.f32.mrf.mxu0 }
 0x607   :  { %v1113_v12 = vadd.f32 %v1112_v20, %v1005_v14  ;;  %v1428_v58 = vadd.f32 %v3452_v61, %v1111_v25 }
 0x608   :  { %v3435_v39 = vpop.eup %2788  ;;  %v1116_v21 = vpop.f32.mrf.mxu0 }
 0x609   :  { %v1117_v29 = vadd.f32 %v1116_v21, %v1012_v49  ;;  %2720 = vmatprep.subr.mxu1 %v3435_v39  ;;  %v1429_v43 = vadd.f32 %v3452_v61, %v1113_v12  ;;  %v1420_v49 = vadd.f32 %v3474_v41, %v1105_v16  ;;  %v1413_v21 = vadd.f32 %v3481_v62, %v1101_v27 }
 0x60a   :  { %v3444_v47 = vpop.eup %2790  ;;  %2721 = vmatpush3.msra.mxu1 %v3435_v39  ;;  %v1118_v33 = vpop.f32.mrf.mxu0  ;;  %v1460_v56 = vmax.f32 %v1428_v58, 0.0 }
 0x60b   :  { %v1119_v42 = vadd.f32 %v1118_v33, %v1013_v30  ;;  %2722 = vmatprep.subr.mxu1 %v3444_v47  ;;  %v3450_v28 = vpop.eup %2792  ;;  %v1436_v48 = vadd.f32 %v3431_v18, %v1117_v29  ;;  %v1461_v14 = vmax.f32 %v1429_v43, 0.0  ;;  %v1412_v29 = vadd.f32 %v3481_v62, %v1099_v17 }
 0x60c   :  { %2723 = vmatpush3.msra.mxu1 %v3444_v47  ;;  %v3457_v19 = vpop.f32.mrf.mxu0  ;;  %v3464_v3 = vpop.eup %2794  ;;  %v1452_v30 = vmax.f32 %v1420_v49, 0.0  ;;  %v1445_v12 = vmax.f32 %v1413_v21, 0.0 }
 0x60d   :  { %v1437_v38 = vadd.f32 %v3431_v18, %v1119_v42  ;;  %2724 = vmatprep.subr.mxu1 %v3450_v28  ;;  %v1468_v24 = vmax.f32 %v1436_v48, 0.0  ;;  %v1444_v33 = vmax.f32 %v1412_v29, 0.0 }
 0x60e   :  { %2725 = vmatpush3.msra.mxu1 %v3450_v28  ;;  %v3470_v6 = vpop.f32.mrf.mxu0 }
 0x60f   :  { %v1469_v51 = vmax.f32 %v1437_v38, 0.0  ;;  %2726 = vmatprep.subr.mxu1 %v3464_v3  ;;  %v1279_v38 = vadd.f32 %v3470_v6, %v993_v32 }
 0x610   :  { %2727 = vmatpush3.msra.mxu1 %v3464_v3  ;;  %v1282_v20 = vpop.f32.mrf.mxu0 }
 0x611   :  { %2729 = vmatmul.mubr.msk.f32.vlgmr.msra.gmra.mxu1 %vm112_vm0, %v2911_v2  ;;  %1145 = vmatprep.subr.mxu1 %v3328_v59  ;;  %v1453_v59 = vmax.f32 %v1421_v22, 0.0 }
 0x612   :  { %1520 = vmatprep.subr.mxu0 %v1469_v51  ;;  %1146 = vmatpush1.msra.mxu1 %v3300_v36  ;;  %v1284_v26 = vpop.f32.mrf.mxu0 }
 0x613   :  { %1521 = vmatpush1.msra.mxu0 %v1468_v24  ;;  %1147 = vmatprep.subr.mxu1 %v3331_v60  ;;  %v1009_v60 = vmul.f32 %v3025_v35, %v3176_v63 }
 0x614   :  { %1522 = vmatprep.subr.mxu0 %v1461_v14  ;;  %2731 = vmatprep.mubr.msk.f32.mxu1 %vm112_vm0, %v2919_v4  ;;  %v1288_v2 = vpop.f32.mrf.mxu0  ;;  %v1016_v4 = vmul.f32 %v3014_v31, %v3150_v52 }
 0x615   :  { %1148 = vmatpush1.msra.mxu1 %v3303_v37  ;;  %1523 = vmatpush1.msra.mxu0 %v1460_v56  ;;  %v1008_v37 = vmul.f32 %v3014_v31, %v3176_v63 }
 0x616   :  { %2732 = vmatmul.mubr.msk.f32.gmra.mxu1 %vm112_vm0, %v2935_v8  ;;  %1149 = vmatprep.subr.mxu1 %v3335_v45  ;;  %v1290_v36 = vpop.f32.mrf.mxu0  ;;  %v3505_v45 = vld [vmem:[%s3688_s7] sm:$0xff] }
 0x617   :  { %1524 = vmatprep.subr.mxu0 %v1453_v59  ;;  %1150 = vmatpush1.msra.mxu1 %v3307_v44  ;;  %v1017_v44 = vmul.f32 %v3025_v35, %v3150_v52  ;;  %v1291_v25 = vadd.f32 %v1290_v36, %v1009_v60  ;;  %v1289_v42 = vadd.f32 %v1288_v2, %v1008_v37  ;;  %v3529_v35 = vld [vmem:[%s3688_s7 + $0x8] sm:$0xff] }
 0x618   :  { %1525 = vmatpush1.msra.mxu0 %v1452_v30  ;;  %1151 = vmatprep.subr.mxu1 %v3339_v9  ;;  %v1294_v8 = vpop.f32.mrf.mxu0  ;;  %v1000_v9 = vmul.f32 %v3014_v31, %v3178_v0  ;;  %v1285_v52 = vadd.f32 %v1284_v26, %v1001_v53  ;;  %v1277_v31 = vadd.f32 %v3457_v19, %v992_v1 }
 0x619   :  { %1526 = vmatprep.subr.mxu0 %v1445_v12  ;;  %1152 = vmatpush1.msra.mxu1 %v3311_v7  ;;  %v1295_v63 = vadd.f32 %v1294_v8, %v1016_v4  ;;  %v1433_v5 = vadd.f32 %v3452_v61, %v1291_v25  ;;  %v1432_v23 = vadd.f32 %v3452_v61, %v1289_v42 }
 0x61a   :  { %1185 = vmatprep.mubr.f32.mxu1 %v3712_v13  ;;  %1527 = vmatpush1.msra.mxu0 %v1444_v33  ;;  %v1296_v11 = vpop.f32.mrf.mxu0  ;;  %v1283_v0 = vadd.f32 %v1282_v20, %v1000_v9  ;;  %v1425_v43 = vadd.f32 %v3474_v41, %v1285_v52  ;;  %v1417_v19 = vadd.f32 %v3481_v62, %v1279_v38 }
 0x61b   :  { %2539 = vmatmul.mubr.msk.f32.vlgmr.msra.gmra.mxu1 %vm112_vm0, %v3384_v34  ;;  %2551 = vmatmul.mubr.msk.f32.vlgmr.msra.gmra.mxu0 %vm112_vm0, %v3505_v45  ;;  %v1297_v7 = vadd.f32 %v1296_v11, %v1017_v44  ;;  %v1440_v48 = vadd.f32 %v3431_v18, %v1295_v63  ;;  %v1465_v51 = vmax.f32 %v1433_v5, 0.0  ;;  %v1416_v17 = vadd.f32 %v3481_v62, %v1277_v31  ;;  %v3562_v44 = vpop.permute.xlu0 %1487 }
 0x61c   :  { %1191 = vmatprep.mubr.f32.mxu1 %v3712_v13  ;;  %1566 = vmatprep.mubr.f32.mxu0 %v3712_v13  ;;  %v1424_v58 = vadd.f32 %v3474_v41, %v1283_v0  ;;  %v1464_v20 = vmax.f32 %v1432_v23, 0.0  ;;  %v1457_v22 = vmax.f32 %v1425_v43, 0.0  ;;  %v1449_v49 = vmax.f32 %v1417_v19, 0.0  ;;  %v3714_v23 = vld [vmem:[#allocation10_spill] sm:$0xff] }
 0x61d   :  { %v1441_v16 = vadd.f32 %v3431_v18, %v1297_v7  ;;  %v1472_v6 = vmax.f32 %v1440_v48, 0.0  ;;  %v1448_v14 = vmax.f32 %v1416_v17, 0.0  ;;  %v3573_v48 = vld [vmem:[%s3690_s9] sm:$0xff] }
 0x61e   :  { %v1456_v24 = vmax.f32 %v1424_v58, 0.0 }
 0x61f   :  { %v1473_v27 = vmax.f32 %v1441_v16, 0.0  ;;  %2540 = vmatmul.mubr.msk.f32.gmra.mxu1 %vm112_vm0, %v3394_v55  ;;  %2552 = vmatmul.mubr.msk.f32.gmra.mxu0 %vm112_vm0, %v3529_v35  ;;  %v3713_v16 = vld [vmem:[#allocation6_spill] sm:$0xff] }
 0x620   :  { %1197 = vmatprep.mubr.f32.mxu1 %v3712_v13  ;;  %1714 = vmatprep.mubr.f32.mxu0 %v3712_v13 }
 0x621   :  { %1674 = vmatprep.subr.mxu0 %v1473_v27 }
 0x622   :  { %1675 = vmatpush1.msra.mxu0 %v1472_v6  ;;  %v3715_v6 = vld [vmem:[#allocation14_spill] sm:$0xff] }
 0x623   :  { %2541 = vmatmul.mubr.msk.f32.gmra.mxu1 %vm112_vm0, %v3402_v46  ;;  %1676 = vmatprep.subr.mxu0 %v1465_v51  ;;  %v3716_v51 = vld [vmem:[#allocation7_spill] sm:$0xff] }
 0x624   :  { %1203 = vmatprep.mubr.f32.mxu1 %v3712_v13  ;;  %1677 = vmatpush1.msra.mxu0 %v1464_v20 }
 0x625   :  { %1678 = vmatprep.subr.mxu0 %v1457_v22 }
 0x626   :  { %1679 = vmatpush1.msra.mxu0 %v1456_v24  ;;  %v3718_v24 = vld [vmem:[#allocation18_spill] sm:$0xff] }
 0x627   :  { %2542 = vmatmul.mubr.msk.f32.gmra.mxu1 %vm112_vm0, %v3410_v54  ;;  %1680 = vmatprep.subr.mxu0 %v1449_v49 }
 0x628   :  { %1681 = vmatpush1.msra.mxu0 %v1448_v14  ;;  %1363 = vmatprep.mubr.f32.mxu1 %v3712_v13 }
 0x629   :  { %2555 = vmatmul.mubr.msk.f32.vlgmr.msra.gmra.mxu0 %vm112_vm0, %v3505_v45 }
 0x62a   :  { %1720 = vmatprep.mubr.f32.mxu0 %v3712_v13 }
 0x62d   :  { %2556 = vmatmul.mubr.msk.f32.gmra.mxu0 %vm112_vm0, %v3529_v35 }
 0x62e   :  { %1895 = vmatprep.mubr.f32.mxu0 %v3712_v13 }
 0x6d1   :  { %v2730_v26 = vpop.f32.mrf.mxu1 }
 0x6d2   :  { %v953_v59 = vadd.f32 %v2730_v26, %v3142_v40 }
 0x6d3   :  { %v933_v21 = vpop.f32.mrf.mxu1 }
 0x6d4   :  { %v952_v36 = vadd.f32 %v933_v21, %v3158_v57  ;;  %v3719_v21 = vld [vmem:[#allocation17_spill] sm:$0xff] }
 0x6d6   :  { %v2733_v56 = vpop.f32.mrf.mxu1 }
 0x6d7   :  { %v955_v29 = vadd.f32 %v2733_v56, %v3068_v50  ;;  %v3564_v50 = vpop.permute.xlu1 %1482 }
 0x6d8   :  { %v943_v2 = vpop.f32.mrf.mxu1 }
 0x6d9   :  { %2796 = vtanh.f32 %v955_v29  ;;  %v954_v30 = vadd.f32 %v943_v2, %v3121_v15 }
 0x6db   :  { %2798 = vtanh.f32 %v954_v30  ;;  %v1187_v12 = vpop.f32.mrf.mxu1  ;;  %v1562_v60 = vpop.f32.mrf.mxu0 }
 0x6dc   :  { %2800 = vtanh.f32 %v953_v59  ;;  %v1563_v63 = vadd.f32 %v1562_v60, %v3564_v50  ;;  %v1188_v56 = vadd.f32 %v1187_v12, %v3719_v21 }
 0x6dd   :  { %v1189_v4 = vpop.f32.mrf.mxu1  ;;  %v1564_v33 = vpop.f32.mrf.mxu0  ;;  %2802 = vtanh.f32 %v952_v36 }
 0x6de   :  { %v1565_v15 = vadd.f32 %v1564_v33, %v3564_v50  ;;  %v1804_v1 = vmax.f32 %v1563_v63, 0.0  ;;  %v1190_v49 = vadd.f32 %v1189_v4, %v3718_v24 }
 0x6df   :  { %v1193_v37 = vpop.f32.mrf.mxu1  ;;  %v1568_v8 = vpop.f32.mrf.mxu0 }
 0x6e0   :  { %v1569_v40 = vadd.f32 %v1568_v8, %v3562_v44  ;;  %v1805_v7 = vmax.f32 %v1565_v15, 0.0  ;;  %v1415_v36 = vadd.f32 %v3481_v62, %v1190_v49 }
 0x6e1   :  { %v1195_v53 = vpop.f32.mrf.mxu1  ;;  %v1570_v25 = vpop.f32.mrf.mxu0 }
 0x6e2   :  { %v1571_v57 = vadd.f32 %v1570_v25, %v3562_v44  ;;  %v1812_v11 = vmax.f32 %v1569_v40, 0.0  ;;  %v1196_v19 = vadd.f32 %v1195_v53, %v3715_v6 }
 0x6e3   :  { %v1199_v9 = vpop.f32.mrf.mxu1 }
 0x6e4   :  { %v1813_v42 = vmax.f32 %v1571_v57, 0.0  ;;  %v1200_v43 = vadd.f32 %v1199_v9, %v3714_v23  ;;  %v1423_v29 = vadd.f32 %v3474_v41, %v1196_v19  ;;  %v3720_v57 = vld [vmem:[#allocation12_spill] sm:$0xff] }
 0x6e5   :  { %v1201_v32 = vpop.f32.mrf.mxu1  ;;  %v3721_v9 = vld [vmem:[#allocation8_spill] sm:$0xff] }
 0x6e6   :  { %v2797_v52 = vpop.eup %2796  ;;  %1859 = vmatprep.subr.mxu0 %v1813_v42  ;;  %v1202_v5 = vadd.f32 %v1201_v32, %v3186_v10  ;;  %v3717_v10 = vld [vmem:[#allocation13_spill] sm:$0xff]  ;;  %v1455_v4 = vmax.f32 %v1423_v29, 0.0 }
 0x6e7   :  { %v1205_v0 = vpop.f32.mrf.mxu1  ;;  %1860 = vmatpush1.msra.mxu0 %v1812_v11  ;;  %1323 = vmatprep.subr.mxu1 %v2797_v52  ;;  %v1194_v20 = vadd.f32 %v1193_v37, %v3717_v10  ;;  %v3722_v11 = vld [vmem:[#allocation11_spill] sm:$0xff] }
 0x6e8   :  { %v2799_v38 = vpop.eup %2798  ;;  %v1206_v31 = vadd.f32 %v1205_v0, %v3713_v16  ;;  %1861 = vmatprep.subr.mxu0 %v1805_v7  ;;  %1324 = vmatpush1.msra.mxu1 %v3435_v39  ;;  %v1431_v14 = vadd.f32 %v3452_v61, %v1202_v5  ;;  %v3725_v16 = vld [vmem:[#allocation15_spill] sm:$0xff] }
 0x6e9   :  { %v1207_v27 = vpop.f32.mrf.mxu1  ;;  %1862 = vmatpush1.msra.mxu0 %v1804_v1  ;;  %1325 = vmatprep.subr.mxu1 %v2799_v38  ;;  %v2801_v58 = vpop.eup %2800  ;;  %v1422_v59 = vadd.f32 %v3474_v41, %v1194_v20  ;;  %v3723_v1 = vld [vmem:[#allocation16_spill] sm:$0xff]  ;;  %v3724_v38 = vld [vmem:[#allocation9_spill] sm:$0xff] }
 0x6ea   :  { %v1208_v17 = vadd.f32 %v1207_v27, %v3716_v51  ;;  %2559 = vmatmul.mubr.msk.f32.vlgmr.msra.gmra.mxu0 %vm1827_vm1, %v3573_v48  ;;  %1326 = vmatpush1.msra.mxu1 %v3444_v47  ;;  %v1438_v22 = vadd.f32 %v3431_v18, %v1206_v31  ;;  %v2803_v39 = vpop.eup %2802  ;;  %v1430_v47 = vadd.f32 %v3452_v61, %v1200_v43  ;;  %v1463_v60 = vmax.f32 %v1431_v14, 0.0  ;;  %v1716_v40 = vpop.f32.mrf.mxu0  ;;  %v3726_v27 = vld [vmem:[#allocation20_spill] sm:$0xff]  ;;  %v3727_v51 = vld [vmem:[#allocation19_spill] sm:$0xff] }
 0x6eb   :  { %1327 = vmatprep.subr.mxu1 %v2801_v58  ;;  %1966 = vmatprep.mubr.f32.mxu0 %v3712_v13  ;;  %v1454_v33 = vmax.f32 %v1422_v59, 0.0 }
 0x6ec   :  { %v1439_v26 = vadd.f32 %v3431_v18, %v1208_v17  ;;  %1328 = vmatpush1.msra.mxu1 %v3450_v28  ;;  %v1470_v30 = vmax.f32 %v1438_v22, 0.0  ;;  %v1414_v28 = vadd.f32 %v3481_v62, %v1188_v56  ;;  %v1462_v12 = vmax.f32 %v1430_v47, 0.0 }
 0x6ed   :  { %1329 = vmatprep.subr.mxu1 %v2803_v39 }
 0x6ee   :  { %v1471_v2 = vmax.f32 %v1439_v26, 0.0  ;;  %1330 = vmatpush1.msra.mxu1 %v3464_v3  ;;  %v1447_v3 = vmax.f32 %v1415_v36, 0.0 }
 0x6ef   :  { %2547 = vmatmul.mubr.msk.f32.vlgmr.msra.gmra.mxu1 %vm112_vm0, %v3384_v34  ;;  %v1446_v34 = vmax.f32 %v1414_v28, 0.0 }
 0x6f0   :  { %1597 = vmatprep.subr.mxu1 %v1471_v2  ;;  %1369 = vmatprep.mubr.f32.mxu1 %v3712_v13 }
 0x6f1   :  { %1598 = vmatpush1.msra.mxu1 %v1470_v30 }
 0x6f2   :  { %1599 = vmatprep.subr.mxu1 %v1463_v60 }
 0x6f3   :  { %1600 = vmatpush1.msra.mxu1 %v1462_v12 }
 0x6f4   :  { %2548 = vmatmul.mubr.msk.f32.gmra.mxu1 %vm112_vm0, %v3394_v55  ;;  %1601 = vmatprep.subr.mxu1 %v1455_v4 }
 0x6f5   :  { %1602 = vmatpush1.msra.mxu1 %v1454_v33  ;;  %1375 = vmatprep.mubr.f32.mxu1 %v3712_v13 }
 0x6f6   :  { %1603 = vmatprep.subr.mxu1 %v1447_v3 }
 0x6f7   :  { %1604 = vmatpush1.msra.mxu1 %v1446_v34 }
 0x6f8   :  { %2549 = vmatmul.mubr.msk.f32.gmra.mxu1 %vm112_vm0, %v3402_v46 }
 0x6f9   :  { %1381 = vmatprep.mubr.f32.mxu1 %v3712_v13 }
 0x6fc   :  { %2550 = vmatmul.mubr.msk.f32.gmra.mxu1 %vm112_vm0, %v3410_v54  ;;  %v1718_v54 = vpop.f32.mrf.mxu0 }
 0x6fd   :  { %1637 = vmatprep.mubr.f32.mxu1 %v3712_v13  ;;  %v1719_v3 = vadd.f32 %v1718_v54, %v3564_v50 }
 0x6fe   :  { %v1722_v7 = vpop.f32.mrf.mxu0 }
 0x6ff   :  { %v1723_v12 = vadd.f32 %v1722_v7, %v3562_v44  ;;  %v1809_v54 = vmax.f32 %v1719_v3, 0.0 }
 0x700   :  { %2553 = vmatmul.mubr.msk.f32.vlgmr.msra.gmra.mxu1 %vm112_vm0, %v3505_v45  ;;  %v1724_v22 = vpop.f32.mrf.mxu0 }
 0x701   :  { %1643 = vmatprep.mubr.f32.mxu1 %v3712_v13 }
 0x704   :  { %2554 = vmatmul.mubr.msk.f32.gmra.mxu1 %vm112_vm0, %v3529_v35 }
 0x705   :  { %1791 = vmatprep.mubr.f32.mxu1 %v3712_v13 }
 0x7aa   :  { %v1897_v21 = vpop.f32.mrf.mxu0 }
 0x7af   :  { %v1365_v55 = vpop.f32.mrf.mxu1 }
 0x7b0   :  { %v1366_v17 = vadd.f32 %v1365_v55, %v3727_v51 }
 0x7b1   :  { %v1367_v37 = vpop.f32.mrf.mxu1 }
 0x7b2   :  { %v1368_v58 = vadd.f32 %v1367_v37, %v3726_v27  ;;  %v3639_v37 = vpop.permute.xlu0 %1824 }
 0x7b4   :  { %v1371_v46 = vpop.f32.mrf.mxu1  ;;  %v1419_v56 = vadd.f32 %v3481_v62, %v1368_v58 }
 0x7b5   :  { %v1372_v31 = vadd.f32 %v1371_v46, %v3725_v16  ;;  %v1717_v46 = vadd.f32 %v1716_v40, %v3564_v50 }
 0x7b6   :  { %v1373_v8 = vpop.f32.mrf.mxu1  ;;  %v1451_v4 = vmax.f32 %v1419_v56, 0.0 }
 0x7b7   :  { %v1374_v0 = vadd.f32 %v1373_v8, %v3723_v1  ;;  %v1426_v49 = vadd.f32 %v3474_v41, %v1372_v31 }
 0x7b8   :  { %v1377_v53 = vpop.f32.mrf.mxu1 }
 0x7b9   :  { %v1378_v32 = vadd.f32 %v1377_v53, %v3722_v11  ;;  %v1427_v39 = vadd.f32 %v3474_v41, %v1374_v0  ;;  %v1725_v41 = vadd.f32 %v1724_v22, %v3562_v44  ;;  %v1458_v60 = vmax.f32 %v1426_v49, 0.0 }
 0x7ba   :  { %v1379_v25 = vpop.f32.mrf.mxu1 }
 0x7bb   :  { %v1380_v63 = vadd.f32 %v1379_v25, %v3720_v57  ;;  %v1434_v10 = vadd.f32 %v3452_v61, %v1378_v32  ;;  %v1459_v59 = vmax.f32 %v1427_v39, 0.0  ;;  %v1817_v53 = vmax.f32 %v1725_v41, 0.0 }
 0x7bc   :  { %v1383_v15 = vpop.f32.mrf.mxu1  ;;  %v1816_v57 = vmax.f32 %v1723_v12, 0.0 }
 0x7bd   :  { %v1384_v42 = vadd.f32 %v1383_v15, %v3721_v9  ;;  %v1435_v6 = vadd.f32 %v3452_v61, %v1380_v63  ;;  %v1466_v29 = vmax.f32 %v1434_v10, 0.0  ;;  %v1808_v63 = vmax.f32 %v1717_v46, 0.0 }
 0x7be   :  { %v1385_v52 = vpop.f32.mrf.mxu1  ;;  %v1898_v9 = vadd.f32 %v1897_v21, %v3639_v37  ;;  %v2130_v21 = vlaneseq }
 0x7bf   :  { %v1386_v5 = vadd.f32 %v1385_v52, %v3724_v38  ;;  %v1442_v23 = vadd.f32 %v3431_v18, %v1384_v42  ;;  %v1467_v47 = vmax.f32 %v1435_v6, 0.0  ;;  %v2123_v42 = vld [vmem:[%s3692_s11] sm:$0x1]  ;;  %s2829_s11 = smov [#allocation3]  }
 0x7c0   :  { %v1639_v43 = vpop.f32.mrf.mxu1  ;;  %v2131_v56 = vshrl.u32 %v2130_v21, 7  ;;  %s2487_s16 = sshll.u32 %s2829_s11, 4  ;;  %s2488_s16 = int_to_ptr.vmem [resolvable:$true] %s2487_s16 }
 0x7c1   :  { %v1443_v19 = vadd.f32 %v3431_v18, %v1386_v5  ;;  %v1474_v14 = vmax.f32 %v1442_v23, 0.0  ;;  %v1418_v18 = vadd.f32 %v3481_v62, %v1366_v17  ;;  %v1640_v28 = vadd.f32 %v1639_v43, %v3564_v50  ;;  %v1899_v62 = vpop.f32.mrf.mxu0  ;;  %s2804_s8 = scalar_lea.vmem %s2488_s16, 128  ;;  %p2809_p1 = scmp.lt.s32.totalorder %s2488_s16, %s2488_s16 }
 0x7c2   :  { %v1641_v20 = vpop.f32.mrf.mxu1  ;;  %v1900_v25 = vadd.f32 %v1899_v62, %v3639_v37  ;;  %p2805_p0 = scmp.ne.s32.totalorder %s2488_s16, %s2804_s8  ;;  %p2810_p2 = scmp.lt.s32.totalorder %s2804_s8, %s2804_s8 }
 0x7c3   :  { %v1475_v24 = vmax.f32 %v1443_v19, 0.0  ;;  %v1642_v30 = vadd.f32 %v1641_v20, %v3564_v50  ;;  %v1450_v34 = vmax.f32 %v1418_v18, 0.0  ;;  %v1806_v15 = vmax.f32 %v1640_v28, 0.0 }
 0x7c4   :  { %v1645_v26 = vpop.f32.mrf.mxu1  ;;  %v2116_v40 = vmax.f32 %v1900_v25, 0.0  ;;  %p2811_p3 = por %p2810_p2, %p2809_p1 }
 0x7c5   :  { %1751 = vmatprep.subr.mxu1 %v1475_v24  ;;  %v1646_v2 = vadd.f32 %v1645_v26, %v3562_v44  ;;  %v1807_v8 = vmax.f32 %v1642_v30, 0.0  ;;  %v2828_v30 = vmov 1966171168  }
 0x7c6   :  { %v1647_v61 = vpop.f32.mrf.mxu1  ;;  %1752 = vmatpush1.msra.mxu1 %v1474_v14  ;;  %p2812_p4 = pnand %p2811_p3, %p2805_p0 }
 0x7c7   :  { %v1648_v36 = vadd.f32 %v1647_v61, %v3562_v44  ;;  %1753 = vmatprep.subr.mxu1 %v1467_v47  ;;  %v1814_v55 = vmax.f32 %v1646_v2, 0.0  ;;  %v2128_v2 = vpop.permute.xlu1 %2127 }
 0x7c8   :  { %1754 = vmatpush1.msra.mxu1 %v1466_v29  ;;  %v2132_v29 = vsub.s32 0, %v2131_v56 }
 0x7c9   :  { %v1815_v33 = vmax.f32 %v1648_v36, 0.0  ;;  %1755 = vmatprep.subr.mxu1 %v1459_v59  ;;  %v2435_v36 = vunpack.c.l.s4 %v2828_v30 }
 0x7ca   :  { %1756 = vmatpush1.msra.mxu1 %v1458_v60  ;;  %v2133_v41 = vrot.slane %v2128_v2, %v2132_v29 }
 0x7cb   :  { %1757 = vmatprep.subr.mxu1 %v1451_v4  ;;  %1930 = vmatprep.subr.mxu0 %v1815_v33  ;;  %v2436_v12 = vunpack.c.0.s8 %v2435_v36 }
 0x7cc   :  { %1758 = vmatpush1.msra.mxu1 %v1450_v34  ;;  %1931 = vmatpush1.msra.mxu0 %v1814_v55 }
 0x7cd   :  { %2557 = vmatmul.mubr.msk.f32.vlgmr.msra.gmra.mxu1 %vm112_vm0, %v3505_v45  ;;  %1932 = vmatprep.subr.mxu0 %v1807_v8  ;;  %v2115_v45 = vmax.f32 %v1898_v9, 0.0 }
 0x7ce   :  { %2001 = vmatprep.subr.mxu1 %v1817_v53  ;;  %1933 = vmatpush1.msra.mxu0 %v1806_v15 }
 0x7cf   :  { %2002 = vmatpush1.msra.mxu1 %v1816_v57  ;;  %2560 = vmatmul.mubr.msk.f32.vlgmr.msra.gmra.mxu0 %vm1827_vm1, %v3573_v48 }
 0x7d0   :  { %2003 = vmatprep.subr.mxu1 %v1809_v54  ;;  %1797 = vmatprep.mubr.f32.mxu1 %v3712_v13 }
 0x7d1   :  { %2004 = vmatpush1.msra.mxu1 %v1808_v63  ;;  %2108 = vmatprep.mubr.f32.mxu0 %v3712_v13 }
 0x7d2   :  { %2558 = vmatmul.mubr.msk.f32.gmra.mxu1 %vm112_vm0, %v3529_v35  ;;  %2168 = vmatprep.subr.mxu1 %v2116_v40 }
 0x7d3   :  { %2037 = vmatprep.mubr.f32.mxu1 %v3712_v13 }
 0x7d6   :  { %2561 = vmatmul.mubr.msk.f32.vlgmr.msra.gmra.mxu1 %vm1827_vm1, %v3573_v48 }
 0x7d7   :  { %2169 = vmatpush1.msra.mxu1 %v2115_v45  ;;  %2202 = vmatprep.mubr.f32.mxu1 %v3712_v13 }
 0x7da   :  { %2563 = vmatmul.mubr.msk.f32.vlgmr.msra.gmra.mxu1 %vm2134_vm2, %v2123_v42 }
 0x7db   :  { %2344 = vmatprep.mubr.f32.mxu1 %v3712_v13 }
 0x88d   :  { %v1793_v35 = vpop.f32.mrf.mxu1 }
 0x88e   :  { %v1794_v16 = vadd.f32 %v1793_v35, %v3564_v50 }
 0x88f   :  { %v1795_v11 = vpop.f32.mrf.mxu1  ;;  %v1968_v32 = vpop.f32.mrf.mxu0 }
 0x890   :  { %v1796_v38 = vadd.f32 %v1795_v11, %v3564_v50  ;;  %v1969_v27 = vadd.f32 %v1968_v32, %v3639_v37  ;;  %v1810_v10 = vmax.f32 %v1794_v16, 0.0 }
 0x891   :  { %v1970_v1 = vpop.f32.mrf.mxu0 }
 0x892   :  { %v1799_v52 = vpop.f32.mrf.mxu1  ;;  %v1971_v23 = vadd.f32 %v1970_v1, %v3639_v37  ;;  %v1811_v19 = vmax.f32 %v1796_v38, 0.0  ;;  %v2117_v50 = vmax.f32 %v1969_v27, 0.0 }
 0x893   :  { %v1800_v7 = vadd.f32 %v1799_v52, %v3562_v44 }
 0x894   :  { %v1801_v0 = vpop.f32.mrf.mxu1  ;;  %v2118_v20 = vmax.f32 %v1971_v23, 0.0 }
 0x895   :  { %v1802_v5 = vadd.f32 %v1801_v0, %v3562_v44  ;;  %v1818_v58 = vmax.f32 %v1800_v7, 0.0 }
 0x896   :  { %v2039_v31 = vpop.f32.mrf.mxu1 }
 0x897   :  { %v1819_v43 = vmax.f32 %v1802_v5, 0.0  ;;  %v2040_v51 = vadd.f32 %v2039_v31, %v3639_v37 }
 0x898   :  { %v2041_v6 = vpop.f32.mrf.mxu1 }
 0x899   :  { %v2042_v17 = vadd.f32 %v2041_v6, %v3639_v37  ;;  %2072 = vmatprep.subr.mxu0 %v1819_v43  ;;  %v2119_v22 = vmax.f32 %v2040_v51, 0.0 }
 0x89a   :  { %2073 = vmatpush1.msra.mxu0 %v1818_v58  ;;  %v2204_v47 = vpop.f32.mrf.mxu1 }
 0x89b   :  { %v2120_v44 = vmax.f32 %v2042_v17, 0.0  ;;  %2074 = vmatprep.subr.mxu0 %v1811_v19  ;;  %v2205_v33 = vadd.f32 %v2204_v47, %v2133_v41 }
 0x89c   :  { %2075 = vmatpush1.msra.mxu0 %v1810_v10  ;;  %v2206_v61 = vpop.f32.mrf.mxu1 }
 0x89d   :  { %2562 = vmatmul.mubr.msk.f32.vlgmr.msra.gmra.mxu0 %vm1827_vm1, %v3573_v48  ;;  %2239 = vmatprep.subr.mxu0 %v2118_v20  ;;  %v2207_v62 = vadd.f32 %v2206_v61, %v2133_v41 }
 0x89e   :  { %2310 = vmatprep.subr.mxu1 %v2120_v44  ;;  %2240 = vmatpush1.msra.mxu0 %v2117_v50 }
 0x89f   :  { %2311 = vmatpush1.msra.mxu1 %v2119_v22  ;;  %2273 = vmatprep.mubr.f32.mxu0 %v3712_v13  ;;  %v2430_v46 = vcombine.low %v2205_v33, %v2207_v62 }
 0x8a0   :  { %2565 = vmatmul.mubr.msk.f32.vlgmr.msra.gmra.mxu1 %vm2134_vm2, %v2123_v42 }
 0x8a1   :  { %2564 = vmatmul.mubr.msk.f32.vlgmr.msra.gmra.mxu0 %vm2134_vm2, %v2123_v42 }
 0x8a2   :  { %2415 = vmatprep.mubr.f32.mxu0 %v3712_v13 }
 0x95d   :  { %v2110_v39 = vpop.f32.mrf.mxu0 }
 0x95e   :  { %v2111_v24 = vadd.f32 %v2110_v39, %v3639_v37 }
 0x95f   :  { %v2112_v49 = vpop.f32.mrf.mxu0 }
 0x960   :  { %v2113_v14 = vadd.f32 %v2112_v49, %v3639_v37  ;;  %v2121_v48 = vmax.f32 %v2111_v24, 0.0  ;;  %v2346_v13 = vpop.f32.mrf.mxu1  ;;  %v2439_v37 = vsub.s32 %v2436_v12, %v2131_v56 }
 0x961   :  { %v2275_v18 = vpop.f32.mrf.mxu0  ;;  %v2347_v8 = vadd.f32 %v2346_v13, %v2133_v41 }
 0x962   :  { %v2122_v26 = vmax.f32 %v2113_v14, 0.0  ;;  %v2348_v28 = vpop.f32.mrf.mxu1  ;;  %v2276_v4 = vadd.f32 %v2275_v18, %v2133_v41  ;;  %v2440_v63 = vrot.slane %v2430_v46, %v2439_v37 }
 0x963   :  { %v2277_v59 = vpop.f32.mrf.mxu0  ;;  %v2349_v3 = vadd.f32 %v2348_v28, %v2133_v41 }
 0x964   :  { %2381 = vmatprep.subr.mxu0 %v2122_v26  ;;  %v2278_v60 = vadd.f32 %v2277_v59, %v2133_v41 }
 0x965   :  { %2382 = vmatpush1.msra.mxu0 %v2121_v48  ;;  %v2432_v25 = vcombine.low %v2347_v8, %v2349_v3 }
 0x966   :  { %2566 = vmatmul.mubr.msk.f32.vlgmr.msra.gmra.mxu0 %vm2134_vm2, %v2123_v42  ;;  %v2431_v34 = vcombine.low %v2276_v4, %v2278_v60 }
 0x967   :  { %v2454_v9 = vrot.slane %v2432_v25, %v2439_v37 }
 0x968   :  { %v2447_v15 = vrot.slane %v2431_v34, %v2439_v37 }
 0x96a   :  { %v2462_v42 = vcombine.low %v2440_v63, %v2447_v15 }
 0x96c   :  { %v2470_v11 = vrot.slane %v2462_v42, %v2439_v37 }
 0xa26   :  { %v2417_v55 = vpop.f32.mrf.mxu0 }
 0xa27   :  { %v2418_v57 = vadd.f32 %v2417_v55, %v2133_v41 }
 0xa28   :  { %v2419_v53 = vpop.f32.mrf.mxu0 }
 0xa29   :  { %v2420_v54 = vadd.f32 %v2419_v53, %v2133_v41 }
 0xa2b   :  { %v2433_v40 = vcombine.low %v2418_v57, %v2420_v54 }
 0xa2d   :  { %v2461_v45 = vrot.slane %v2433_v40, %v2439_v37 }
 0xa2f   :  { %v2463_v35 = vcombine.low %v2454_v9, %v2461_v45 }
 0xa31   :  { %v2477_v32 = vrot.slane %v2463_v35, %v2439_v37 }
 0xa33   :  { %v2478_v52 = vcombine.low %v2470_v11, %v2477_v32 }
 0xa35   :  { %2480 = vst [vmem:[#allocation3] sm:$0xff] %v2478_v52 }
 0xa36   :  { %2815 = shalt.err (!%p2812_p4)
}
 0xa37   :  { %2490 = dma.vmem_to_hbm [thread:$0]  %s2488_s16, 128, %s3694_s13, [#allocation4]  }
 0xa38   :  { %2824 = dma.done.wait [#allocation4], 128  }
 0xa39   :  { %2825 = vsyncadd [#allocation4], 4294967168 }
 0xa3a   :  { %2494 = vsyncpa [#allocation4], 1 }

</bundles_post_ra>
